<compile_context>
chip_gen: v6e
topology: v6e:2x2x1
jax: 0.10.0
libtpu: 0.0.40
codegen_flags: <defaults>
</compile_context>

<pallas_src>
import functools

import jax
import jax.numpy as jnp
from jax.experimental import pallas as pl
from jax.experimental.pallas import tpu as pltpu


def _attention_kernel(x_ref, wqkv_ref, wproj_ref, bproj_ref, *refs,
                      num_heads, head_dim, seq_len, batch_tile,
                      return_attn, compute_dtype, approx_softmax):
    if return_attn:
        out_ref, attn_ref, qkv_scr, o_scr = refs
    else:
        out_ref, qkv_scr, o_scr = refs
        attn_ref = None

    Bt, N, Dh, H = batch_tile, seq_len, head_dim, num_heads
    C = H * Dh
    rows = Bt * N

    # ---- QKV projection: single lane-dense (rows, C) @ (C, 3C) MXU pass ----
    # The softmax scale was folded into the Q columns of w_qkv on the host,
    # so a single full-tile store suffices (no per-step scaling pass).
    x2d = x_ref[...].reshape(rows, C).astype(compute_dtype)
    qkv_scr[...] = jnp.dot(
        x2d, wqkv_ref[...],
        preferred_element_type=jnp.float32).astype(compute_dtype)

    # ---- Per-head attention -------------------------------------------------
    # Heads are grouped so each o_scr store is >=128 lanes wide when Dh < 128
    # (e.g. head pairs at Dh=64) -> no masked partial-lane vst on v5e.
    if Dh >= 128:
        heads_per_group = 1
    else:
        heads_per_group = max(1, min(H, 128 // Dh))
        while H % heads_per_group:
            heads_per_group -= 1
    n_groups = H // heads_per_group

    for g in range(n_groups):
        o_parts = []
        for j in range(heads_per_group):
            h = g * heads_per_group + j
            c0 = h * Dh
            q_h = qkv_scr[:, c0:c0 + Dh].reshape(Bt, N, Dh)          # pre-scaled
            k_h = qkv_scr[:, C + c0:C + c0 + Dh].reshape(Bt, N, Dh)
            v_h = qkv_scr[:, 2 * C + c0:2 * C + c0 + Dh].reshape(Bt, N, Dh)

            logits = jnp.einsum('bnd,bmd->bnm', q_h, k_h,
                                preferred_element_type=jnp.float32)  # (Bt,N,N)

            # Numerically-stable softmax in f32; divide via EUP reciprocal.
            m = jnp.max(logits, axis=-1, keepdims=True)
            p = jnp.exp(logits - m)
            denom = jnp.sum(p, axis=-1, keepdims=True)
            if approx_softmax:
                attn = p * pl.reciprocal(denom, approx=True)
            else:
                attn = p / denom

            if return_attn:
                attn_ref[:, h] = attn.astype(attn_ref.dtype)

            # attn_drop(p=0.0) is identity; skipped.
            o_h = jnp.einsum('bnm,bmd->bnd', attn.astype(compute_dtype), v_h,
                             preferred_element_type=jnp.float32)     # (Bt,N,Dh)
            o_parts.append(o_h.reshape(rows, Dh).astype(compute_dtype))

        g0 = g * heads_per_group * Dh
        gw = heads_per_group * Dh
        o_blk = o_parts[0] if len(o_parts) == 1 else jnp.concatenate(o_parts, -1)
        o_scr[:, g0:g0 + gw] = o_blk

    # ---- Output projection: single lane-dense (rows, C) @ (C, C) pass -----
    out = jnp.dot(o_scr[...], wproj_ref[...],
                  preferred_element_type=jnp.float32) + bproj_ref[...]
    out_ref[...] = out.reshape(Bt, N, C).astype(out_ref.dtype)
    # proj_drop(p=0.0) is identity; skipped.


def attention_forward(x, w_qkv, w_proj, b_proj, *, num_heads,
                      batch_tile=1, return_attn=True,
                      compute_dtype=jnp.bfloat16, attn_dtype=None,
                      approx_softmax=True, vmem_limit_bytes=None):
    """x: (B, N, C); w_qkv: (C, 3C); w_proj: (C, C); b_proj: (1, C).

    Returns (out, attn_map) like the PyTorch module; attn_map is None when
    return_attn=False.  attn_dtype defaults to x.dtype (use bf16 to halve the
    O(B*H*N^2) attention-map HBM writeback and its VMEM block).
    """
    B, N, C = x.shape
    assert C % num_heads == 0, "dim must be divisible by num_heads"
    assert B % batch_tile == 0, "batch must be divisible by batch_tile"
    head_dim = C // num_heads
    scale = head_dim ** (-0.5)
    attn_dtype = x.dtype if attn_dtype is None else attn_dtype

    # Fold the softmax scale into the Q columns of the packed QKV weight and
    # cast the resident weights to the MXU compute dtype (one-time host work;
    # halves their HBM->VMEM DMA on bf16-MXU parts).  Bias stays in f32.
    w_qkv = jnp.concatenate([w_qkv[:, :C] * scale, w_qkv[:, C:]],
                            axis=1).astype(compute_dtype)
    w_proj = w_proj.astype(compute_dtype)
    b_proj = b_proj.astype(jnp.float32)

    kernel = functools.partial(
        _attention_kernel,
        num_heads=num_heads, head_dim=head_dim, seq_len=N,
        batch_tile=batch_tile, return_attn=return_attn,
        compute_dtype=compute_dtype, approx_softmax=approx_softmax)

    out_shapes = [jax.ShapeDtypeStruct((B, N, C), x.dtype)]
    out_specs = [pl.BlockSpec((batch_tile, N, C), lambda b: (b, 0, 0))]
    if return_attn:
        out_shapes.append(
            jax.ShapeDtypeStruct((B, num_heads, N, N), attn_dtype))
        out_specs.append(
            pl.BlockSpec((batch_tile, num_heads, N, N),
                         lambda b: (b, 0, 0, 0)))

    # Constant-index weights/bias: single-buffer (Buffered(1)) to halve their
    # resident VMEM footprint.
    in_specs = [
        pl.BlockSpec((batch_tile, N, C), lambda b: (b, 0, 0)),
        pl.BlockSpec((C, 3 * C), lambda b: (0, 0),
                     pipeline_mode=pl.Buffered(1)),
        pl.BlockSpec((C, C), lambda b: (0, 0),
                     pipeline_mode=pl.Buffered(1)),
        pl.BlockSpec((1, C), lambda b: (0, 0),
                     pipeline_mode=pl.Buffered(1)),
    ]

    # ---- Derive the scoped-VMEM limit from the live set -------------------
    if vmem_limit_bytes is None:
        cdt = jnp.dtype(compute_dtype).itemsize
        rows = batch_tile * N
        est = 0
        est += 2 * batch_tile * N * C * x.dtype.itemsize            # x blocks
        est += 2 * batch_tile * N * C * x.dtype.itemsize            # out blocks
        if return_attn:
            est += 2 * batch_tile * num_heads * N * N * jnp.dtype(attn_dtype).itemsize
        est += C * 3 * C * cdt + C * C * cdt + C * 4                 # weights (1x)
        est += rows * 3 * C * cdt + rows * C * cdt                   # scratches
        est += 4 * batch_tile * N * N * 4                            # softmax temps
        vmem_limit_bytes = int(min(max(32 << 20, 1.3 * est), 128 << 20))

    grid_spec = pltpu.PrefetchScalarGridSpec(
        num_scalar_prefetch=0,
        grid=(B // batch_tile,),
        in_specs=in_specs,
        out_specs=out_specs,
        scratch_shapes=[
            pltpu.VMEM((batch_tile * N, 3 * C), compute_dtype),  # packed qkv
            pltpu.VMEM((batch_tile * N, C), compute_dtype),      # head outputs
        ],
    )

    result = pl.pallas_call(
        kernel,
        out_shape=tuple(out_shapes),
        grid_spec=grid_spec,
        compiler_params=pltpu.CompilerParams(
            # Batch-tile axis is independent -> shardable across TensorCores
            # (keep B // batch_tile >= 2 on v7x so neither core idles).
            dimension_semantics=("parallel",),
            vmem_limit_bytes=vmem_limit_bytes,
        ),
    )(x, w_qkv, w_proj, b_proj)

    if return_attn:
        return result
    return result[0], None


def _reference(x, w_qkv, w_proj, b_proj, *, num_heads):
    B, N, C = x.shape
    head_dim = C // num_heads
    scale = head_dim ** (-0.5)
    qkv = (x @ w_qkv).reshape(B, N, 3, num_heads, head_dim).transpose(2, 0, 3, 1, 4)
    q, k, v = qkv[0], qkv[1], qkv[2]
    attn = jnp.einsum('bhnd,bhmd->bhnm', q, k) * scale
    attn = jax.nn.softmax(attn, axis=-1)
    o = jnp.einsum('bhnm,bhmd->bhnd', attn, v)
    o = o.transpose(0, 2, 1, 3).reshape(B, N, C)
    out = o @ w_proj + b_proj[0]
    return out, attn


if __name__ == "__main__":
    # Small shapes consistent with the module: dim=32, num_heads=8 -> head_dim=4.
    B, N, C = 2, 8, 32
    num_heads = 8

    key = jax.random.PRNGKey(0)
    kx, kqkv, kproj, kb = jax.random.split(key, 4)

    x = jax.random.normal(kx, (B, N, C), dtype=jnp.float32)
    # nn.Linear weights: qkv.weight (3C, C), proj.weight (C, C); pre-transpose.
    w_qkv = (jax.random.normal(kqkv, (3 * C, C), dtype=jnp.float32) * 0.05).T
    w_proj = (jax.random.normal(kproj, (C, C), dtype=jnp.float32) * 0.05).T
    b_proj = jax.random.normal(kb, (1, C), dtype=jnp.float32) * 0.05

    ref_out, ref_attn = _reference(x, w_qkv, w_proj, b_proj, num_heads=num_heads)

    # 1) f32 MXU path, exact softmax divide (structure/accuracy sanity check).
    out, attn = attention_forward(x, w_qkv, w_proj, b_proj, num_heads=num_heads,
                                  batch_tile=1, compute_dtype=jnp.float32,
                                  approx_softmax=False)
    out, attn = jax.block_until_ready((out, attn))
    assert jnp.allclose(out, ref_out, atol=5e-3, rtol=5e-3)
    assert jnp.allclose(attn, ref_attn, atol=5e-3, rtol=5e-3)

    # 2) bf16 MXU path, bf16 attention-map writeback, batch_tile=2.
    out, attn = attention_forward(x, w_qkv, w_proj, b_proj, num_heads=num_heads,
                                  batch_tile=2, compute_dtype=jnp.bfloat16,
                                  attn_dtype=jnp.bfloat16)
    out, attn = jax.block_until_ready((out, attn))
    assert jnp.allclose(out, ref_out, atol=3e-2, rtol=3e-2)
    assert jnp.allclose(attn.astype(jnp.float32), ref_attn, atol=3e-2, rtol=3e-2)

    # 3) attention-map output disabled (drops the O(H*N^2) HBM writeback).
    out_only, attn_none = attention_forward(
        x, w_qkv, w_proj, b_proj, num_heads=num_heads,
        batch_tile=2, compute_dtype=jnp.bfloat16, return_attn=False)
    out_only = jax.block_until_ready(out_only)
    assert attn_none is None
    assert jnp.allclose(out_only, ref_out, atol=3e-2, rtol=3e-2)

    print("KERNEL_OK")
</pallas_src>

<mosaic_0001>
module attributes {stable_mosaic.version = 11 : i64} {
  func.func @_attention_kernel(%arg0: i32, %arg1: memref<1x8x32xf32, #tpu.memory_space<vmem>>, %arg2: memref<32x96xf32, #tpu.memory_space<vmem>>, %arg3: memref<32x32xf32, #tpu.memory_space<vmem>>, %arg4: memref<1x32xf32, #tpu.memory_space<vmem>>, %arg5: memref<1x8x32xf32, #tpu.memory_space<vmem>>, %arg6: memref<1x8x8x8xf32, #tpu.memory_space<vmem>>, %arg7: memref<8x96xf32, #tpu.memory_space<vmem>>, %arg8: memref<8x32xf32, #tpu.memory_space<vmem>>) attributes {dimension_semantics = [#tpu.dimension_semantics<parallel>], iteration_bounds = array<i64: 2>, scalar_prefetch = 0 : i64, scratch_operands = 2 : i64, tpu.core_type = #tpu.core_type<tc>, window_params = [{transform_indices = @transform_0, window_bounds = array<i64: 1, 8, 32>}, {pipeline_mode = #tpu.pipeline_mode<synchronous>, transform_indices = @transform_1, window_bounds = array<i64: 32, 96>}, {pipeline_mode = #tpu.pipeline_mode<synchronous>, transform_indices = @transform_2, window_bounds = array<i64: 32, 32>}, {pipeline_mode = #tpu.pipeline_mode<synchronous>, transform_indices = @transform_3, window_bounds = array<i64: 1, 32>}, {transform_indices = @transform_4, window_bounds = array<i64: 1, 8, 32>}, {transform_indices = @transform_5, window_bounds = array<i64: 1, 8, 8, 8>}]} {
    %c0 = arith.constant 0 : index
    %c0_0 = arith.constant 0 : index
    %c0_1 = arith.constant 0 : index
    %0 = vector.load %arg1[%c0, %c0_0, %c0_1] : memref<1x8x32xf32, #tpu.memory_space<vmem>>, vector<1x8x32xf32>
    %1 = vector.shape_cast %0 : vector<1x8x32xf32> to vector<8x32xf32>
    %c0_2 = arith.constant 0 : index
    %c0_3 = arith.constant 0 : index
    %2 = vector.load %arg2[%c0_2, %c0_3] : memref<32x96xf32, #tpu.memory_space<vmem>>, vector<32x96xf32>
    %cst = arith.constant dense<0.000000e+00> : vector<8x96xf32>
    %3 = tpu.matmul %1, %2, %cst {dimension_numbers = #tpu.dot_dimension_numbers<[1], [0], [0], [1], [0, 0, 1, 1], [], []>} : vector<8x32xf32>, vector<32x96xf32>, vector<8x96xf32> -> vector<8x96xf32>
    %c0_4 = arith.constant 0 : index
    %c0_5 = arith.constant 0 : index
    %4 = vector.load %arg7[%c0_4, %c0_5] : memref<8x96xf32, #tpu.memory_space<vmem>>, vector<8x96xf32>
    tpu.vector_store %arg7[%c0_4, %c0_5], %3 {strides = array<i32>} : memref<8x96xf32, #tpu.memory_space<vmem>>, vector<8x96xf32>,
    %c0_6 = arith.constant 0 : index
    %c0_7 = arith.constant 0 : index
    %5 = vector.load %arg7[%c0_6, %c0_7] : memref<8x96xf32, #tpu.memory_space<vmem>>, vector<8x4xf32>
    %6 = vector.shape_cast %5 : vector<8x4xf32> to vector<1x8x4xf32>
    %c0_8 = arith.constant 0 : index
    %c32 = arith.constant 32 : index
    %7 = vector.load %arg7[%c0_8, %c32] : memref<8x96xf32, #tpu.memory_space<vmem>>, vector<8x4xf32>
    %8 = vector.shape_cast %7 : vector<8x4xf32> to vector<1x8x4xf32>
    %c0_9 = arith.constant 0 : index
    %c64 = arith.constant 64 : index
    %9 = vector.load %arg7[%c0_9, %c64] : memref<8x96xf32, #tpu.memory_space<vmem>>, vector<8x4xf32>
    %10 = vector.shape_cast %9 : vector<8x4xf32> to vector<1x8x4xf32>
    "tpu.trace_start"() <{level = 10 : i32, message = "bnd,bmd->bnm"}> : () -> ()
    %cst_10 = arith.constant dense<0.000000e+00> : vector<1x8x8xf32>
    %11 = tpu.matmul %6, %8, %cst_10 {dimension_numbers = #tpu.dot_dimension_numbers<[2], [2], [1], [1], [0, 0, 0, 1, 1, 1], [0], [0]>} : vector<1x8x4xf32>, vector<1x8x4xf32>, vector<1x8x8xf32> -> vector<1x8x8xf32>
    "tpu.trace_stop"() : () -> ()
    %cst_11 = arith.constant dense<0xFF800000> : vector<1x8xf32>
    %12 = vector.multi_reduction <maximumf>, %11, %cst_11 [2] : vector<1x8x8xf32> to vector<1x8xf32>
    %13 = vector.shape_cast %12 : vector<1x8xf32> to vector<1x8x1xf32>
    %14 = vector.broadcast %13 : vector<1x8x1xf32> to vector<1x8x8xf32>
    %15 = arith.subf %11, %14 : vector<1x8x8xf32>
    %16 = math.exp %15 : vector<1x8x8xf32>
    %cst_12 = arith.constant dense<0.000000e+00> : vector<1x8xf32>
    %17 = vector.multi_reduction <add>, %16, %cst_12 [2] : vector<1x8x8xf32> to vector<1x8xf32>
    %18 = vector.shape_cast %17 : vector<1x8xf32> to vector<1x8x1xf32>
    %19 = vector.broadcast %18 : vector<1x8x1xf32> to vector<1x8x8xf32>
    %20 = arith.divf %16, %19 : vector<1x8x8xf32>
    %c0_13 = arith.constant 0 : index
    %c0_14 = arith.constant 0 : index
    %c0_15 = arith.constant 0 : index
    %c0_16 = arith.constant 0 : index
    %21 = vector.load %arg6[%c0_13, %c0_14, %c0_15, %c0_16] : memref<1x8x8x8xf32, #tpu.memory_space<vmem>>, vector<1x1x8x8xf32>
    %22 = vector.shape_cast %21 : vector<1x1x8x8xf32> to vector<1x8x8xf32>
    %23 = vector.shape_cast %20 : vector<1x8x8xf32> to vector<1x1x8x8xf32>
    tpu.vector_store %arg6[%c0_13, %c0_14, %c0_15, %c0_16], %23 {strides = array<i32>} : memref<1x8x8x8xf32, #tpu.memory_space<vmem>>, vector<1x1x8x8xf32>,
    "tpu.trace_start"() <{level = 10 : i32, message = "bnm,bmd->bnd"}> : () -> ()
    %cst_17 = arith.constant dense<0.000000e+00> : vector<1x8x4xf32>
    %24 = tpu.matmul %20, %10, %cst_17 {dimension_numbers = #tpu.dot_dimension_numbers<[2], [1], [1], [2], [0, 0, 0, 1, 1, 2], [0], [0]>} : vector<1x8x8xf32>, vector<1x8x4xf32>, vector<1x8x4xf32> -> vector<1x8x4xf32>
    "tpu.trace_stop"() : () -> ()
    %25 = vector.shape_cast %24 : vector<1x8x4xf32> to vector<8x4xf32>
    %c0_18 = arith.constant 0 : index
    %c4 = arith.constant 4 : index
    %26 = vector.load %arg7[%c0_18, %c4] : memref<8x96xf32, #tpu.memory_space<vmem>>, vector<8x4xf32>
    %27 = vector.shape_cast %26 : vector<8x4xf32> to vector<1x8x4xf32>
    %c0_19 = arith.constant 0 : index
    %c36 = arith.constant 36 : index
    %28 = vector.load %arg7[%c0_19, %c36] : memref<8x96xf32, #tpu.memory_space<vmem>>, vector<8x4xf32>
    %29 = vector.shape_cast %28 : vector<8x4xf32> to vector<1x8x4xf32>
    %c0_20 = arith.constant 0 : index
    %c68 = arith.constant 68 : index
    %30 = vector.load %arg7[%c0_20, %c68] : memref<8x96xf32, #tpu.memory_space<vmem>>, vector<8x4xf32>
    %31 = vector.shape_cast %30 : vector<8x4xf32> to vector<1x8x4xf32>
    "tpu.trace_start"() <{level = 10 : i32, message = "bnd,bmd->bnm"}> : () -> ()
    %cst_21 = arith.constant dense<0.000000e+00> : vector<1x8x8xf32>
    %32 = tpu.matmul %27, %29, %cst_21 {dimension_numbers = #tpu.dot_dimension_numbers<[2], [2], [1], [1], [0, 0, 0, 1, 1, 1], [0], [0]>} : vector<1x8x4xf32>, vector<1x8x4xf32>, vector<1x8x8xf32> -> vector<1x8x8xf32>
    "tpu.trace_stop"() : () -> ()
    %cst_22 = arith.constant dense<0xFF800000> : vector<1x8xf32>
    %33 = vector.multi_reduction <maximumf>, %32, %cst_22 [2] : vector<1x8x8xf32> to vector<1x8xf32>
    %34 = vector.shape_cast %33 : vector<1x8xf32> to vector<1x8x1xf32>
    %35 = vector.broadcast %34 : vector<1x8x1xf32> to vector<1x8x8xf32>
    %36 = arith.subf %32, %35 : vector<1x8x8xf32>
    %37 = math.exp %36 : vector<1x8x8xf32>
    %cst_23 = arith.constant dense<0.000000e+00> : vector<1x8xf32>
    %38 = vector.multi_reduction <add>, %37, %cst_23 [2] : vector<1x8x8xf32> to vector<1x8xf32>
    %39 = vector.shape_cast %38 : vector<1x8xf32> to vector<1x8x1xf32>
    %40 = vector.broadcast %39 : vector<1x8x1xf32> to vector<1x8x8xf32>
    %41 = arith.divf %37, %40 : vector<1x8x8xf32>
    %c0_24 = arith.constant 0 : index
    %c1 = arith.constant 1 : index
    %c0_25 = arith.constant 0 : index
    %c0_26 = arith.constant 0 : index
    %42 = vector.load %arg6[%c0_24, %c1, %c0_25, %c0_26] : memref<1x8x8x8xf32, #tpu.memory_space<vmem>>, vector<1x1x8x8xf32>
    %43 = vector.shape_cast %42 : vector<1x1x8x8xf32> to vector<1x8x8xf32>
    %44 = vector.shape_cast %41 : vector<1x8x8xf32> to vector<1x1x8x8xf32>
    tpu.vector_store %arg6[%c0_24, %c1, %c0_25, %c0_26], %44 {strides = array<i32>} : memref<1x8x8x8xf32, #tpu.memory_space<vmem>>, vector<1x1x8x8xf32>,
    "tpu.trace_start"() <{level = 10 : i32, message = "bnm,bmd->bnd"}> : () -> ()
    %cst_27 = arith.constant dense<0.000000e+00> : vector<1x8x4xf32>
    %45 = tpu.matmul %41, %31, %cst_27 {dimension_numbers = #tpu.dot_dimension_numbers<[2], [1], [1], [2], [0, 0, 0, 1, 1, 2], [0], [0]>} : vector<1x8x8xf32>, vector<1x8x4xf32>, vector<1x8x4xf32> -> vector<1x8x4xf32>
    "tpu.trace_stop"() : () -> ()
    %46 = vector.shape_cast %45 : vector<1x8x4xf32> to vector<8x4xf32>
    %c0_28 = arith.constant 0 : index
    %c8 = arith.constant 8 : index
    %47 = vector.load %arg7[%c0_28, %c8] : memref<8x96xf32, #tpu.memory_space<vmem>>, vector<8x4xf32>
    %48 = vector.shape_cast %47 : vector<8x4xf32> to vector<1x8x4xf32>
    %c0_29 = arith.constant 0 : index
    %c40 = arith.constant 40 : index
    %49 = vector.load %arg7[%c0_29, %c40] : memref<8x96xf32, #tpu.memory_space<vmem>>, vector<8x4xf32>
    %50 = vector.shape_cast %49 : vector<8x4xf32> to vector<1x8x4xf32>
    %c0_30 = arith.constant 0 : index
    %c72 = arith.constant 72 : index
    %51 = vector.load %arg7[%c0_30, %c72] : memref<8x96xf32, #tpu.memory_space<vmem>>, vector<8x4xf32>
    %52 = vector.shape_cast %51 : vector<8x4xf32> to vector<1x8x4xf32>
    "tpu.trace_start"() <{level = 10 : i32, message = "bnd,bmd->bnm"}> : () -> ()
    %cst_31 = arith.constant dense<0.000000e+00> : vector<1x8x8xf32>
    %53 = tpu.matmul %48, %50, %cst_31 {dimension_numbers = #tpu.dot_dimension_numbers<[2], [2], [1], [1], [0, 0, 0, 1, 1, 1], [0], [0]>} : vector<1x8x4xf32>, vector<1x8x4xf32>, vector<1x8x8xf32> -> vector<1x8x8xf32>
    "tpu.trace_stop"() : () -> ()
    %cst_32 = arith.constant dense<0xFF800000> : vector<1x8xf32>
    %54 = vector.multi_reduction <maximumf>, %53, %cst_32 [2] : vector<1x8x8xf32> to vector<1x8xf32>
    %55 = vector.shape_cast %54 : vector<1x8xf32> to vector<1x8x1xf32>
    %56 = vector.broadcast %55 : vector<1x8x1xf32> to vector<1x8x8xf32>
    %57 = arith.subf %53, %56 : vector<1x8x8xf32>
    %58 = math.exp %57 : vector<1x8x8xf32>
    %cst_33 = arith.constant dense<0.000000e+00> : vector<1x8xf32>
    %59 = vector.multi_reduction <add>, %58, %cst_33 [2] : vector<1x8x8xf32> to vector<1x8xf32>
    %60 = vector.shape_cast %59 : vector<1x8xf32> to vector<1x8x1xf32>
    %61 = vector.broadcast %60 : vector<1x8x1xf32> to vector<1x8x8xf32>
    %62 = arith.divf %58, %61 : vector<1x8x8xf32>
    %c0_34 = arith.constant 0 : index
    %c2 = arith.constant 2 : index
    %c0_35 = arith.constant 0 : index
    %c0_36 = arith.constant 0 : index
    %63 = vector.load %arg6[%c0_34, %c2, %c0_35, %c0_36] : memref<1x8x8x8xf32, #tpu.memory_space<vmem>>, vector<1x1x8x8xf32>
    %64 = vector.shape_cast %63 : vector<1x1x8x8xf32> to vector<1x8x8xf32>
    %65 = vector.shape_cast %62 : vector<1x8x8xf32> to vector<1x1x8x8xf32>
    tpu.vector_store %arg6[%c0_34, %c2, %c0_35, %c0_36], %65 {strides = array<i32>} : memref<1x8x8x8xf32, #tpu.memory_space<vmem>>, vector<1x1x8x8xf32>,
    "tpu.trace_start"() <{level = 10 : i32, message = "bnm,bmd->bnd"}> : () -> ()
    %cst_37 = arith.constant dense<0.000000e+00> : vector<1x8x4xf32>
    %66 = tpu.matmul %62, %52, %cst_37 {dimension_numbers = #tpu.dot_dimension_numbers<[2], [1], [1], [2], [0, 0, 0, 1, 1, 2], [0], [0]>} : vector<1x8x8xf32>, vector<1x8x4xf32>, vector<1x8x4xf32> -> vector<1x8x4xf32>
    "tpu.trace_stop"() : () -> ()
    %67 = vector.shape_cast %66 : vector<1x8x4xf32> to vector<8x4xf32>
    %c0_38 = arith.constant 0 : index
    %c12 = arith.constant 12 : index
    %68 = vector.load %arg7[%c0_38, %c12] : memref<8x96xf32, #tpu.memory_space<vmem>>, vector<8x4xf32>
    %69 = vector.shape_cast %68 : vector<8x4xf32> to vector<1x8x4xf32>
    %c0_39 = arith.constant 0 : index
    %c44 = arith.constant 44 : index
    %70 = vector.load %arg7[%c0_39, %c44] : memref<8x96xf32, #tpu.memory_space<vmem>>, vector<8x4xf32>
    %71 = vector.shape_cast %70 : vector<8x4xf32> to vector<1x8x4xf32>
    %c0_40 = arith.constant 0 : index
    %c76 = arith.constant 76 : index
    %72 = vector.load %arg7[%c0_40, %c76] : memref<8x96xf32, #tpu.memory_space<vmem>>, vector<8x4xf32>
    %73 = vector.shape_cast %72 : vector<8x4xf32> to vector<1x8x4xf32>
    "tpu.trace_start"() <{level = 10 : i32, message = "bnd,bmd->bnm"}> : () -> ()
    %cst_41 = arith.constant dense<0.000000e+00> : vector<1x8x8xf32>
    %74 = tpu.matmul %69, %71, %cst_41 {dimension_numbers = #tpu.dot_dimension_numbers<[2], [2], [1], [1], [0, 0, 0, 1, 1, 1], [0], [0]>} : vector<1x8x4xf32>, vector<1x8x4xf32>, vector<1x8x8xf32> -> vector<1x8x8xf32>
    "tpu.trace_stop"() : () -> ()
    %cst_42 = arith.constant dense<0xFF800000> : vector<1x8xf32>
    %75 = vector.multi_reduction <maximumf>, %74, %cst_42 [2] : vector<1x8x8xf32> to vector<1x8xf32>
    %76 = vector.shape_cast %75 : vector<1x8xf32> to vector<1x8x1xf32>
    %77 = vector.broadcast %76 : vector<1x8x1xf32> to vector<1x8x8xf32>
    %78 = arith.subf %74, %77 : vector<1x8x8xf32>
    %79 = math.exp %78 : vector<1x8x8xf32>
    %cst_43 = arith.constant dense<0.000000e+00> : vector<1x8xf32>
    %80 = vector.multi_reduction <add>, %79, %cst_43 [2] : vector<1x8x8xf32> to vector<1x8xf32>
    %81 = vector.shape_cast %80 : vector<1x8xf32> to vector<1x8x1xf32>
    %82 = vector.broadcast %81 : vector<1x8x1xf32> to vector<1x8x8xf32>
    %83 = arith.divf %79, %82 : vector<1x8x8xf32>
    %c0_44 = arith.constant 0 : index
    %c3 = arith.constant 3 : index
    %c0_45 = arith.constant 0 : index
    %c0_46 = arith.constant 0 : index
    %84 = vector.load %arg6[%c0_44, %c3, %c0_45, %c0_46] : memref<1x8x8x8xf32, #tpu.memory_space<vmem>>, vector<1x1x8x8xf32>
    %85 = vector.shape_cast %84 : vector<1x1x8x8xf32> to vector<1x8x8xf32>
    %86 = vector.shape_cast %83 : vector<1x8x8xf32> to vector<1x1x8x8xf32>
    tpu.vector_store %arg6[%c0_44, %c3, %c0_45, %c0_46], %86 {strides = array<i32>} : memref<1x8x8x8xf32, #tpu.memory_space<vmem>>, vector<1x1x8x8xf32>,
    "tpu.trace_start"() <{level = 10 : i32, message = "bnm,bmd->bnd"}> : () -> ()
    %cst_47 = arith.constant dense<0.000000e+00> : vector<1x8x4xf32>
    %87 = tpu.matmul %83, %73, %cst_47 {dimension_numbers = #tpu.dot_dimension_numbers<[2], [1], [1], [2], [0, 0, 0, 1, 1, 2], [0], [0]>} : vector<1x8x8xf32>, vector<1x8x4xf32>, vector<1x8x4xf32> -> vector<1x8x4xf32>
    "tpu.trace_stop"() : () -> ()
    %88 = vector.shape_cast %87 : vector<1x8x4xf32> to vector<8x4xf32>
    %c0_48 = arith.constant 0 : index
    %c16 = arith.constant 16 : index
    %89 = vector.load %arg7[%c0_48, %c16] : memref<8x96xf32, #tpu.memory_space<vmem>>, vector<8x4xf32>
    %90 = vector.shape_cast %89 : vector<8x4xf32> to vector<1x8x4xf32>
    %c0_49 = arith.constant 0 : index
    %c48 = arith.constant 48 : index
    %91 = vector.load %arg7[%c0_49, %c48] : memref<8x96xf32, #tpu.memory_space<vmem>>, vector<8x4xf32>
    %92 = vector.shape_cast %91 : vector<8x4xf32> to vector<1x8x4xf32>
    %c0_50 = arith.constant 0 : index
    %c80 = arith.constant 80 : index
    %93 = vector.load %arg7[%c0_50, %c80] : memref<8x96xf32, #tpu.memory_space<vmem>>, vector<8x4xf32>
    %94 = vector.shape_cast %93 : vector<8x4xf32> to vector<1x8x4xf32>
    "tpu.trace_start"() <{level = 10 : i32, message = "bnd,bmd->bnm"}> : () -> ()
    %cst_51 = arith.constant dense<0.000000e+00> : vector<1x8x8xf32>
    %95 = tpu.matmul %90, %92, %cst_51 {dimension_numbers = #tpu.dot_dimension_numbers<[2], [2], [1], [1], [0, 0, 0, 1, 1, 1], [0], [0]>} : vector<1x8x4xf32>, vector<1x8x4xf32>, vector<1x8x8xf32> -> vector<1x8x8xf32>
    "tpu.trace_stop"() : () -> ()
    %cst_52 = arith.constant dense<0xFF800000> : vector<1x8xf32>
    %96 = vector.multi_reduction <maximumf>, %95, %cst_52 [2] : vector<1x8x8xf32> to vector<1x8xf32>
    %97 = vector.shape_cast %96 : vector<1x8xf32> to vector<1x8x1xf32>
    %98 = vector.broadcast %97 : vector<1x8x1xf32> to vector<1x8x8xf32>
    %99 = arith.subf %95, %98 : vector<1x8x8xf32>
    %100 = math.exp %99 : vector<1x8x8xf32>
    %cst_53 = arith.constant dense<0.000000e+00> : vector<1x8xf32>
    %101 = vector.multi_reduction <add>, %100, %cst_53 [2] : vector<1x8x8xf32> to vector<1x8xf32>
    %102 = vector.shape_cast %101 : vector<1x8xf32> to vector<1x8x1xf32>
    %103 = vector.broadcast %102 : vector<1x8x1xf32> to vector<1x8x8xf32>
    %104 = arith.divf %100, %103 : vector<1x8x8xf32>
    %c0_54 = arith.constant 0 : index
    %c4_55 = arith.constant 4 : index
    %c0_56 = arith.constant 0 : index
    %c0_57 = arith.constant 0 : index
    %105 = vector.load %arg6[%c0_54, %c4_55, %c0_56, %c0_57] : memref<1x8x8x8xf32, #tpu.memory_space<vmem>>, vector<1x1x8x8xf32>
    %106 = vector.shape_cast %105 : vector<1x1x8x8xf32> to vector<1x8x8xf32>
    %107 = vector.shape_cast %104 : vector<1x8x8xf32> to vector<1x1x8x8xf32>
    tpu.vector_store %arg6[%c0_54, %c4_55, %c0_56, %c0_57], %107 {strides = array<i32>} : memref<1x8x8x8xf32, #tpu.memory_space<vmem>>, vector<1x1x8x8xf32>,
    "tpu.trace_start"() <{level = 10 : i32, message = "bnm,bmd->bnd"}> : () -> ()
    %cst_58 = arith.constant dense<0.000000e+00> : vector<1x8x4xf32>
    %108 = tpu.matmul %104, %94, %cst_58 {dimension_numbers = #tpu.dot_dimension_numbers<[2], [1], [1], [2], [0, 0, 0, 1, 1, 2], [0], [0]>} : vector<1x8x8xf32>, vector<1x8x4xf32>, vector<1x8x4xf32> -> vector<1x8x4xf32>
    "tpu.trace_stop"() : () -> ()
    %109 = vector.shape_cast %108 : vector<1x8x4xf32> to vector<8x4xf32>
    %c0_59 = arith.constant 0 : index
    %c20 = arith.constant 20 : index
    %110 = vector.load %arg7[%c0_59, %c20] : memref<8x96xf32, #tpu.memory_space<vmem>>, vector<8x4xf32>
    %111 = vector.shape_cast %110 : vector<8x4xf32> to vector<1x8x4xf32>
    %c0_60 = arith.constant 0 : index
    %c52 = arith.constant 52 : index
    %112 = vector.load %arg7[%c0_60, %c52] : memref<8x96xf32, #tpu.memory_space<vmem>>, vector<8x4xf32>
    %113 = vector.shape_cast %112 : vector<8x4xf32> to vector<1x8x4xf32>
    %c0_61 = arith.constant 0 : index
    %c84 = arith.constant 84 : index
    %114 = vector.load %arg7[%c0_61, %c84] : memref<8x96xf32, #tpu.memory_space<vmem>>, vector<8x4xf32>
    %115 = vector.shape_cast %114 : vector<8x4xf32> to vector<1x8x4xf32>
    "tpu.trace_start"() <{level = 10 : i32, message = "bnd,bmd->bnm"}> : () -> ()
    %cst_62 = arith.constant dense<0.000000e+00> : vector<1x8x8xf32>
    %116 = tpu.matmul %111, %113, %cst_62 {dimension_numbers = #tpu.dot_dimension_numbers<[2], [2], [1], [1], [0, 0, 0, 1, 1, 1], [0], [0]>} : vector<1x8x4xf32>, vector<1x8x4xf32>, vector<1x8x8xf32> -> vector<1x8x8xf32>
    "tpu.trace_stop"() : () -> ()
    %cst_63 = arith.constant dense<0xFF800000> : vector<1x8xf32>
    %117 = vector.multi_reduction <maximumf>, %116, %cst_63 [2] : vector<1x8x8xf32> to vector<1x8xf32>
    %118 = vector.shape_cast %117 : vector<1x8xf32> to vector<1x8x1xf32>
    %119 = vector.broadcast %118 : vector<1x8x1xf32> to vector<1x8x8xf32>
    %120 = arith.subf %116, %119 : vector<1x8x8xf32>
    %121 = math.exp %120 : vector<1x8x8xf32>
    %cst_64 = arith.constant dense<0.000000e+00> : vector<1x8xf32>
    %122 = vector.multi_reduction <add>, %121, %cst_64 [2] : vector<1x8x8xf32> to vector<1x8xf32>
    %123 = vector.shape_cast %122 : vector<1x8xf32> to vector<1x8x1xf32>
    %124 = vector.broadcast %123 : vector<1x8x1xf32> to vector<1x8x8xf32>
    %125 = arith.divf %121, %124 : vector<1x8x8xf32>
    %c0_65 = arith.constant 0 : index
    %c5 = arith.constant 5 : index
    %c0_66 = arith.constant 0 : index
    %c0_67 = arith.constant 0 : index
    %126 = vector.load %arg6[%c0_65, %c5, %c0_66, %c0_67] : memref<1x8x8x8xf32, #tpu.memory_space<vmem>>, vector<1x1x8x8xf32>
    %127 = vector.shape_cast %126 : vector<1x1x8x8xf32> to vector<1x8x8xf32>
    %128 = vector.shape_cast %125 : vector<1x8x8xf32> to vector<1x1x8x8xf32>
    tpu.vector_store %arg6[%c0_65, %c5, %c0_66, %c0_67], %128 {strides = array<i32>} : memref<1x8x8x8xf32, #tpu.memory_space<vmem>>, vector<1x1x8x8xf32>,
    "tpu.trace_start"() <{level = 10 : i32, message = "bnm,bmd->bnd"}> : () -> ()
    %cst_68 = arith.constant dense<0.000000e+00> : vector<1x8x4xf32>
    %129 = tpu.matmul %125, %115, %cst_68 {dimension_numbers = #tpu.dot_dimension_numbers<[2], [1], [1], [2], [0, 0, 0, 1, 1, 2], [0], [0]>} : vector<1x8x8xf32>, vector<1x8x4xf32>, vector<1x8x4xf32> -> vector<1x8x4xf32>
    "tpu.trace_stop"() : () -> ()
    %130 = vector.shape_cast %129 : vector<1x8x4xf32> to vector<8x4xf32>
    %c0_69 = arith.constant 0 : index
    %c24 = arith.constant 24 : index
    %131 = vector.load %arg7[%c0_69, %c24] : memref<8x96xf32, #tpu.memory_space<vmem>>, vector<8x4xf32>
    %132 = vector.shape_cast %131 : vector<8x4xf32> to vector<1x8x4xf32>
    %c0_70 = arith.constant 0 : index
    %c56 = arith.constant 56 : index
    %133 = vector.load %arg7[%c0_70, %c56] : memref<8x96xf32, #tpu.memory_space<vmem>>, vector<8x4xf32>
    %134 = vector.shape_cast %133 : vector<8x4xf32> to vector<1x8x4xf32>
    %c0_71 = arith.constant 0 : index
    %c88 = arith.constant 88 : index
    %135 = vector.load %arg7[%c0_71, %c88] : memref<8x96xf32, #tpu.memory_space<vmem>>, vector<8x4xf32>
    %136 = vector.shape_cast %135 : vector<8x4xf32> to vector<1x8x4xf32>
    "tpu.trace_start"() <{level = 10 : i32, message = "bnd,bmd->bnm"}> : () -> ()
    %cst_72 = arith.constant dense<0.000000e+00> : vector<1x8x8xf32>
    %137 = tpu.matmul %132, %134, %cst_72 {dimension_numbers = #tpu.dot_dimension_numbers<[2], [2], [1], [1], [0, 0, 0, 1, 1, 1], [0], [0]>} : vector<1x8x4xf32>, vector<1x8x4xf32>, vector<1x8x8xf32> -> vector<1x8x8xf32>
    "tpu.trace_stop"() : () -> ()
    %cst_73 = arith.constant dense<0xFF800000> : vector<1x8xf32>
    %138 = vector.multi_reduction <maximumf>, %137, %cst_73 [2] : vector<1x8x8xf32> to vector<1x8xf32>
    %139 = vector.shape_cast %138 : vector<1x8xf32> to vector<1x8x1xf32>
    %140 = vector.broadcast %139 : vector<1x8x1xf32> to vector<1x8x8xf32>
    %141 = arith.subf %137, %140 : vector<1x8x8xf32>
    %142 = math.exp %141 : vector<1x8x8xf32>
    %cst_74 = arith.constant dense<0.000000e+00> : vector<1x8xf32>
    %143 = vector.multi_reduction <add>, %142, %cst_74 [2] : vector<1x8x8xf32> to vector<1x8xf32>
    %144 = vector.shape_cast %143 : vector<1x8xf32> to vector<1x8x1xf32>
    %145 = vector.broadcast %144 : vector<1x8x1xf32> to vector<1x8x8xf32>
    %146 = arith.divf %142, %145 : vector<1x8x8xf32>
    %c0_75 = arith.constant 0 : index
    %c6 = arith.constant 6 : index
    %c0_76 = arith.constant 0 : index
    %c0_77 = arith.constant 0 : index
    %147 = vector.load %arg6[%c0_75, %c6, %c0_76, %c0_77] : memref<1x8x8x8xf32, #tpu.memory_space<vmem>>, vector<1x1x8x8xf32>
    %148 = vector.shape_cast %147 : vector<1x1x8x8xf32> to vector<1x8x8xf32>
    %149 = vector.shape_cast %146 : vector<1x8x8xf32> to vector<1x1x8x8xf32>
    tpu.vector_store %arg6[%c0_75, %c6, %c0_76, %c0_77], %149 {strides = array<i32>} : memref<1x8x8x8xf32, #tpu.memory_space<vmem>>, vector<1x1x8x8xf32>,
    "tpu.trace_start"() <{level = 10 : i32, message = "bnm,bmd->bnd"}> : () -> ()
    %cst_78 = arith.constant dense<0.000000e+00> : vector<1x8x4xf32>
    %150 = tpu.matmul %146, %136, %cst_78 {dimension_numbers = #tpu.dot_dimension_numbers<[2], [1], [1], [2], [0, 0, 0, 1, 1, 2], [0], [0]>} : vector<1x8x8xf32>, vector<1x8x4xf32>, vector<1x8x4xf32> -> vector<1x8x4xf32>
    "tpu.trace_stop"() : () -> ()
    %151 = vector.shape_cast %150 : vector<1x8x4xf32> to vector<8x4xf32>
    %c0_79 = arith.constant 0 : index
    %c28 = arith.constant 28 : index
    %152 = vector.load %arg7[%c0_79, %c28] : memref<8x96xf32, #tpu.memory_space<vmem>>, vector<8x4xf32>
    %153 = vector.shape_cast %152 : vector<8x4xf32> to vector<1x8x4xf32>
    %c0_80 = arith.constant 0 : index
    %c60 = arith.constant 60 : index
    %154 = vector.load %arg7[%c0_80, %c60] : memref<8x96xf32, #tpu.memory_space<vmem>>, vector<8x4xf32>
    %155 = vector.shape_cast %154 : vector<8x4xf32> to vector<1x8x4xf32>
    %c0_81 = arith.constant 0 : index
    %c92 = arith.constant 92 : index
    %156 = vector.load %arg7[%c0_81, %c92] : memref<8x96xf32, #tpu.memory_space<vmem>>, vector<8x4xf32>
    %157 = vector.shape_cast %156 : vector<8x4xf32> to vector<1x8x4xf32>
    "tpu.trace_start"() <{level = 10 : i32, message = "bnd,bmd->bnm"}> : () -> ()
    %cst_82 = arith.constant dense<0.000000e+00> : vector<1x8x8xf32>
    %158 = tpu.matmul %153, %155, %cst_82 {dimension_numbers = #tpu.dot_dimension_numbers<[2], [2], [1], [1], [0, 0, 0, 1, 1, 1], [0], [0]>} : vector<1x8x4xf32>, vector<1x8x4xf32>, vector<1x8x8xf32> -> vector<1x8x8xf32>
    "tpu.trace_stop"() : () -> ()
    %cst_83 = arith.constant dense<0xFF800000> : vector<1x8xf32>
    %159 = vector.multi_reduction <maximumf>, %158, %cst_83 [2] : vector<1x8x8xf32> to vector<1x8xf32>
    %160 = vector.shape_cast %159 : vector<1x8xf32> to vector<1x8x1xf32>
    %161 = vector.broadcast %160 : vector<1x8x1xf32> to vector<1x8x8xf32>
    %162 = arith.subf %158, %161 : vector<1x8x8xf32>
    %163 = math.exp %162 : vector<1x8x8xf32>
    %cst_84 = arith.constant dense<0.000000e+00> : vector<1x8xf32>
    %164 = vector.multi_reduction <add>, %163, %cst_84 [2] : vector<1x8x8xf32> to vector<1x8xf32>
    %165 = vector.shape_cast %164 : vector<1x8xf32> to vector<1x8x1xf32>
    %166 = vector.broadcast %165 : vector<1x8x1xf32> to vector<1x8x8xf32>
    %167 = arith.divf %163, %166 : vector<1x8x8xf32>
    %c0_85 = arith.constant 0 : index
    %c7 = arith.constant 7 : index
    %c0_86 = arith.constant 0 : index
    %c0_87 = arith.constant 0 : index
    %168 = vector.load %arg6[%c0_85, %c7, %c0_86, %c0_87] : memref<1x8x8x8xf32, #tpu.memory_space<vmem>>, vector<1x1x8x8xf32>
    %169 = vector.shape_cast %168 : vector<1x1x8x8xf32> to vector<1x8x8xf32>
    %170 = vector.shape_cast %167 : vector<1x8x8xf32> to vector<1x1x8x8xf32>
    tpu.vector_store %arg6[%c0_85, %c7, %c0_86, %c0_87], %170 {strides = array<i32>} : memref<1x8x8x8xf32, #tpu.memory_space<vmem>>, vector<1x1x8x8xf32>,
    "tpu.trace_start"() <{level = 10 : i32, message = "bnm,bmd->bnd"}> : () -> ()
    %cst_88 = arith.constant dense<0.000000e+00> : vector<1x8x4xf32>
    %171 = tpu.matmul %167, %157, %cst_88 {dimension_numbers = #tpu.dot_dimension_numbers<[2], [1], [1], [2], [0, 0, 0, 1, 1, 2], [0], [0]>} : vector<1x8x8xf32>, vector<1x8x4xf32>, vector<1x8x4xf32> -> vector<1x8x4xf32>
    "tpu.trace_stop"() : () -> ()
    %172 = vector.shape_cast %171 : vector<1x8x4xf32> to vector<8x4xf32>
    %173 = tpu.concatenate %25, %46, %67, %88, %109, %130, %151, %172 in 1 : vector<8x4xf32>, vector<8x4xf32>, vector<8x4xf32>, vector<8x4xf32>, vector<8x4xf32>, vector<8x4xf32>, vector<8x4xf32>, vector<8x4xf32> -> vector<8x32xf32>
    %c0_89 = arith.constant 0 : index
    %c0_90 = arith.constant 0 : index
    %174 = vector.load %arg8[%c0_89, %c0_90] : memref<8x32xf32, #tpu.memory_space<vmem>>, vector<8x32xf32>
    tpu.vector_store %arg8[%c0_89, %c0_90], %173 {strides = array<i32>} : memref<8x32xf32, #tpu.memory_space<vmem>>, vector<8x32xf32>,
    %c0_91 = arith.constant 0 : index
    %c0_92 = arith.constant 0 : index
    %175 = vector.load %arg8[%c0_91, %c0_92] : memref<8x32xf32, #tpu.memory_space<vmem>>, vector<8x32xf32>
    %c0_93 = arith.constant 0 : index
    %c0_94 = arith.constant 0 : index
    %176 = vector.load %arg3[%c0_93, %c0_94] : memref<32x32xf32, #tpu.memory_space<vmem>>, vector<32x32xf32>
    %cst_95 = arith.constant dense<0.000000e+00> : vector<8x32xf32>
    %177 = tpu.matmul %175, %176, %cst_95 {dimension_numbers = #tpu.dot_dimension_numbers<[1], [0], [0], [1], [0, 0, 1, 1], [], []>} : vector<8x32xf32>, vector<32x32xf32>, vector<8x32xf32> -> vector<8x32xf32>
    %c0_96 = arith.constant 0 : index
    %c0_97 = arith.constant 0 : index
    %178 = vector.load %arg4[%c0_96, %c0_97] : memref<1x32xf32, #tpu.memory_space<vmem>>, vector<1x32xf32>
    %179 = vector.broadcast %178 : vector<1x32xf32> to vector<8x32xf32>
    %180 = arith.addf %177, %179 : vector<8x32xf32>
    %181 = vector.shape_cast %180 : vector<8x32xf32> to vector<1x8x32xf32>
    %c0_98 = arith.constant 0 : index
    %c0_99 = arith.constant 0 : index
    %c0_100 = arith.constant 0 : index
    %182 = vector.load %arg5[%c0_98, %c0_99, %c0_100] : memref<1x8x32xf32, #tpu.memory_space<vmem>>, vector<1x8x32xf32>
    tpu.vector_store %arg5[%c0_98, %c0_99, %c0_100], %181 {strides = array<i32>} : memref<1x8x32xf32, #tpu.memory_space<vmem>>, vector<1x8x32xf32>,
    return
  }
  func.func @transform_0(%arg0: i32) -> (i32, i32, i32) {
    %c0_i32 = arith.constant 0 : i32
    %c0_i32_0 = arith.constant 0 : i32
    %c0_i32_1 = arith.constant 0 : i32
    return %arg0, %c0_i32, %c0_i32_0 : i32, i32, i32
  }
  func.func @transform_1(%arg0: i32) -> (i32, i32) {
    %c0_i32 = arith.constant 0 : i32
    %c0_i32_0 = arith.constant 0 : i32
    %c0_i32_1 = arith.constant 0 : i32
    return %c0_i32, %c0_i32_0 : i32, i32
  }
  func.func @transform_2(%arg0: i32) -> (i32, i32) {
    %c0_i32 = arith.constant 0 : i32
    %c0_i32_0 = arith.constant 0 : i32
    %c0_i32_1 = arith.constant 0 : i32
    return %c0_i32, %c0_i32_0 : i32, i32
  }
  func.func @transform_3(%arg0: i32) -> (i32, i32) {
    %c0_i32 = arith.constant 0 : i32
    %c0_i32_0 = arith.constant 0 : i32
    %c0_i32_1 = arith.constant 0 : i32
    return %c0_i32, %c0_i32_0 : i32, i32
  }
  func.func @transform_4(%arg0: i32) -> (i32, i32, i32) {
    %c0_i32 = arith.constant 0 : i32
    %c0_i32_0 = arith.constant 0 : i32
    %c0_i32_1 = arith.constant 0 : i32
    return %arg0, %c0_i32, %c0_i32_0 : i32, i32, i32
  }
  func.func @transform_5(%arg0: i32) -> (i32, i32, i32, i32) {
    %c0_i32 = arith.constant 0 : i32
    %c0_i32_0 = arith.constant 0 : i32
    %c0_i32_1 = arith.constant 0 : i32
    %c0_i32_2 = arith.constant 0 : i32
    return %arg0, %c0_i32, %c0_i32_0, %c0_i32_1 : i32, i32, i32, i32
  }
}

</mosaic_0001>

<bundles_post_ra>
// kernel: tpu_custom_call.1
= control target key start
LH: loop header
LB: loop body
LE: loop exit
PB: predicated region body
PF: predicated region fallthrough
CT: control target
= control target key end

     0   :  { %11 = vsyncpa [#allocation5], 0  ;;  %s2963_s0 = inlined_call_operand.hbm [shape: f32[2,8,32], index: 0, kind: input, shape index: {}]   ;;  %s2964_s1 = inlined_call_operand.hbm [shape: f32[32,96], index: 1, kind: input, shape index: {}]   ;;  %s2965_s2 = inlined_call_operand.hbm [shape: f32[32,32], index: 2, kind: input, shape index: {}]   ;;  %s2966_s3 = inlined_call_operand.vmem [shape: f32[1,32], index: 3, kind: input, shape index: {}]   ;;  %s2967_s4 = inlined_call_operand.hbm [shape: f32[2,8,32], index: 4, kind: output, shape index: {0}]   ;;  %s2968_s5 = inlined_call_operand.hbm [shape: f32[2,8,8,8], index: 5, kind: output, shape index: {1}]  }
   0x1   :  { %13 = vsyncpa [#allocation5 + $0x1], 0 }
   0x2   :  { %14 = vsyncpa [#allocation8], 0 }
   0x3   :  { %15 = vsyncpa [#allocation6], 0 }
   0x4   :  { %17 = vsyncpa [#allocation6 + $0x1], 0 }
   0x5   :  { %18 = vsyncpa [#allocation12], 0 }
   0x6   :  { %20 = vsyncpa [#allocation12 + $0x1], 0  ;;  %s2583_s18 = smov 0   ;;  %s2585_s19 = smov 0  }
   0x7   :  { %s2587_s20 = smov 0   ;;  %s2589_s21 = smov 0  }
   0x8 LB: > { %s2604_s22 = sadd.s32 4294967295, %s2511_s21   ;;  %s1995_s23 = sadd.s32 4294967294, %s2511_s21   ;;  %s2511_s21 = sphi %s2589_s21, %s2990_s21   ;;  %s2507_s20 = sphi %s2587_s20, %s2989_s20   ;;  %s2503_s19 = sphi %s2585_s19, %s2988_s19   ;;  %s2499_s18 = sphi %s2583_s18, %s2987_s18  }
   0x9   : > { %p46_p0 = scmp.ne.s32.totalorder %s2503_s19, %s2499_s18  ;;  %p2969_p1 = scmp.eq.s32.totalorder %s2604_s22, 0 }
   0xa   : > { %p139_p3 = scmp.eq.s32.totalorder %s1995_s23, 1  ;;  %p1996_p5 = scmp.ge.s32.totalorder %s2511_s21, 1 }
   0xb   : > { %p2613_p4 = por %p2969_p1, %p46_p0  ;;  %p172_p7 = scmp.lt.s32.totalorder %s2511_s21, 3 }
   0xc   : > { %p2618_p6 = por %p139_p3, %p46_p0  ;;  %s2513_s27 = smov [#allocation7]  }
   0xd   : > { %s2973_s24 = scalar_select %p2613_p4, 1, 0 }
   0xe   : > { %s2974_s25 = scalar_select %p2618_p6, 1, 0 }
   0xf   : > { %p2623_p8 = pnand %p1996_p5, %p172_p7  ;;  %s184_s28 = sshll.u32 %s2513_s27, 4  ;;  %s185_s28 = int_to_ptr.vmem [resolvable:$true] %s184_s28 }
  0x10   : > { %s2514_s30 = smov [#allocation9]   ;;  %s2344_s7 = scalar_lea.vmem %s185_s28, 512 }
  0x11   : > { %s2975_s26 = scalar_select %p2623_p8, 1, 0 }
  0x12   : > { %p2208_p9 = pneg %p2623_p8  ;;  %s197_s6 = sshll.u32 %s2514_s30, 4  ;;  %s198_s6 = int_to_ptr.vmem [resolvable:$true] %s197_s6 }
  0x13   : > { %p2345_p13 = scmp.ne.s32.totalorder %s185_s28, %s2344_s7  ;;  %p2352_p5 = scmp.lt.s32.totalorder %s185_s28, %s185_s28 }
  0x14   : > { %p2632_p11 = pnand %p2208_p9, %p2969_p1  ;;  %p2353_p7 = scmp.lt.s32.totalorder %s2344_s7, %s2344_s7 }
  0x16   : > { %p2335_p12 = pneg %p2632_p11  ;;  %p2354_p10 = por %p2353_p7, %p2352_p5 }
  0x18   : > { %p2347_p0 = pnand %p2345_p13, %p2335_p12 }
  0x1a   : > { %p2348_p3 = pneg %p2347_p0 }
  0x1c   : > { %p2355_p9 = pnand %p2354_p10, %p2348_p3 }
  0x1e   : > { %2358 = shalt.err (!%p2355_p9)
}
  0x1f   : > { %s2515_s8 = smov 128   ;;  %s2516_s9 = smov 8  }
  0x20   : > { %2211 = dma.hbm_to_vmem [thread:$0]  (!%p2632_p11), %s2964_s1, 512, %s185_s28, [#allocation8], %s2515_s8, %s2515_s8, %s2516_s9  }
  0x21   : > { %s2370_s12 = scalar_lea.vmem %s198_s6, 512  ;;  %p2378_p2 = scmp.lt.s32.totalorder %s198_s6, %s198_s6 }
  0x22   : > { %p2371_p1 = scmp.ne.s32.totalorder %s198_s6, %s2370_s12  ;;  %p2379_p6 = scmp.lt.s32.totalorder %s2370_s12, %s2370_s12 }
  0x24   : > { %p2373_p13 = pnand %p2371_p1, %p2335_p12  ;;  %p2380_p5 = por %p2379_p6, %p2378_p2 }
  0x26   : > { %p2374_p0 = pneg %p2373_p13 }
  0x28   : > { %p2381_p10 = pnand %p2380_p5, %p2374_p0 }
  0x2a   : > { %2384 = shalt.err (!%p2381_p10)
}
  0x2b   : > { %2214 = dma.hbm_to_vmem [thread:$0]  (!%p2632_p11), %s2965_s2, 512, %s198_s6, [#allocation8], %s2515_s8, %s2515_s8, %s2516_s9  }
  0x2c   : > { %s2655_s15 = sadd.s32 1, %s2511_s21   ;;  %s33_s16 = sadd.s32 1, %s2507_s20 }
  0x2d   : > { %s30_s17 = ssub.s32 %s2511_s21, %s2655_s15  ;;  %p40_p1 = scmp.ne.s32.totalorder %s2507_s20, %s2503_s19 }
  0x2e   : > { %p31_p2 = scmp.eq.s32.totalorder %s30_s17, 0  ;;  %p41_p6 = scmp.eq.s32.totalorder %s2511_s21, 0 }
  0x2f   : > { %p2977_p12 = scmp.eq.s32.totalorder %s2604_s22, 1  ;;  %p2228_p7 = scmp.lt.s32.totalorder %s2511_s21, 2 }
  0x30   : > { %s2671_s27 = scalar_select %p31_p2, %s2507_s20, %s33_s16  }
  0x31   : > { %p2665_p3 = por %p2977_p12, %p40_p1  ;;  %p42_p9 = por %p41_p6, %p40_p1 }
  0x32   : > { %s214_s28 = sand.u32 1, %s2507_s20   ;;  %s2001_s30 = sshll.u32 %s2511_s21, 7 }
  0x33   : > { %s2978_s23 = scalar_select %p2665_p3, 1, 0 }
  0x34   : > { %s2000_s29 = sshll.u32 %s214_s28, 3  ;;  %s2678_s8 = scalar_lea.hbm %s2963_s0, %s2001_s30 }
  0x35   : > { %s218_s9 = scalar_lea.vmem [#allocation4], %s2000_s29  ;;  %p2680_p11 = pnand %p2228_p7, %p42_p9 }
  0x36   : > { %s225_s10 = sshll.u32 %s218_s9, 4  ;;  %s215_s12 = scalar_lea.sflag [#allocation5], %s214_s28  ;;  %s226_s10 = int_to_ptr.vmem [resolvable:$true] %s225_s10 }
  0x37   : > { %s2385_s13 = scalar_lea.hbm %s2678_s8, 128  ;;  %p2387_p0 = pneg %p2680_p11 }
  0x38   : > { %p2386_p13 = scmp.ne.s32.totalorder %s2678_s8, %s2385_s13  ;;  %s2390_s17 = scalar_lea.hbm %s2963_s0, 256 }
  0x39   : > { %p2391_p1 = scmp.lt.s32.totalorder %s2678_s8, %s2963_s0  ;;  %p2392_p2 = scmp.lt.s32.totalorder %s2390_s17, %s2385_s13 }
  0x3a   : > { %p2388_p5 = pnand %p2387_p0, %p2386_p13 }
  0x3b   : > { %p2393_p6 = por %p2392_p2, %p2391_p1 }
  0x3c   : > { %p2389_p10 = pneg %p2388_p5 }
  0x3e   : > { %p2394_p12 = pnand %p2393_p6, %p2389_p10 }
  0x40   : > { %2397 = shalt.err (!%p2394_p12)
}
  0x41   : > { %s2398_s6 = scalar_lea.vmem %s226_s10, 128  ;;  %s2517_s28 = smov [#allocation4]  }
  0x42   : > { %p2399_p7 = scmp.ne.s32.totalorder %s226_s10, %s2398_s6  ;;  %s2403_s7 = sshll.u32 %s2517_s28, 4  ;;  %s2404_s7 = int_to_ptr.vmem [resolvable:$false] %s2403_s7 }
  0x43   : > { %s2405_s9 = scalar_lea.vmem %s2404_s7, 256  ;;  %p2406_p13 = scmp.lt.s32.totalorder %s226_s10, %s2404_s7 }
  0x44   : > { %p2401_p9 = pnand %p2399_p7, %p2387_p0  ;;  %p2407_p5 = scmp.lt.s32.totalorder %s2405_s9, %s2398_s6 }
  0x46   : > { %p2402_p3 = pneg %p2401_p9  ;;  %p2408_p4 = por %p2407_p5, %p2406_p13 }
  0x48   : > { %p2409_p8 = pnand %p2408_p4, %p2402_p3 }
  0x4a   : > { %2412 = shalt.err (!%p2409_p8)
}
  0x4b   : > { %2218 = dma.hbm_to_vmem [thread:$0]  (!%p2680_p11), %s2678_s8, 128, %s226_s10, %s215_s12  }
  0x4c   : > { %p2980_p10 = scmp.ne.s32.totalorder %s2975_s26, 0 }
  0x4d   : > { %s2701_s13 = sand.u32 (!%p2980_p10), 1, %s2503_s19   ;;  %p2981_p4 = scmp.ne.s32.totalorder (!%p2980_p10), %s2973_s24, 0 }
  0x4e   : > { %234 = sbr.rel (%p2980_p10) target bundleno = 1995 (0x7cb), region = 36  ;;  %s2003_s14 = sshll.u32 (!%p2980_p10), %s2701_s13, 3 }
  0x4f   : > { %s237_s16 = scalar_lea.sflag (!%p2980_p10), [#allocation5], %s2701_s13  ;;  %s240_s17 = scalar_lea.vmem (!%p2980_p10), [#allocation4], %s2003_s14 }
  0x53   : > { %2482 = dma.done.wait (%p2981_p4), %s237_s16, 128  }
  0x54   : > { %2484 = vsyncadd (%p2981_p4), %s237_s16, 4294967168  ;;  %p2982_p8 = scmp.eq.s32.totalorder %s2604_s22, 0 }
  0x56   : > { %2486 = dma.done.wait (%p2982_p8), [#allocation8], 1024   ;;  %p2983_p3 = pmov %p2982_p8 }
  0x57   : > { %v2518_v0 = vmov 0.0   ;;  %vm2519_vm0 = vmmov 0   ;;  %v284_v1 = vld [vmem:[#allocation7 + $0x18] sm:$0xff]  ;;  %v283_v2 = vld [vmem:[#allocation7 + $0x10] sm:$0xff]  ;;  %v282_v3 = vld [vmem:[#allocation7 + $0x8] sm:$0xff]  ;;  %vm285_vm1 = vcmask 261120  }
  0x58   : > { %2488 = vsyncadd (%p2983_p3), [#allocation8], 4294966272  ;;  %2092 = vmatprep.subr.mxu0 %v2518_v0  ;;  %2100 = vmatprep.mubr.msk.f32.mxu0 %vm2519_vm0, %v2518_v0  ;;  %v281_v4 = vld [vmem:[#allocation7] sm:$0xff]  ;;  %v280_v5 = vld [vmem:[%s240_s17] sm:$0xff]  ;;  %vm359_vm2 = vcmask 785408   ;;  %s2520_s24 = smov 64  }
  0x59   : > { %2103 = vmatprep.subr.mxu1 %v2518_v0  ;;  %2105 = vmatprep.mubr.msk.f32.mxu1 %vm2519_vm0, %v2518_v0  ;;  %s2521_s26 = smov 96   ;;  %s2522_s8 = smov 92   ;;  %vm365_vm3 = vcmask 31744   ;;  %vm440_vm4 = vcmask 64512   ;;  %vm1742_vm5 = vcmask 97280   ;;  %vm1744_vm6 = vcmask 130048  }
  0x5a   : > { %2093 = vmatpush3.msra.mxu0 %v284_v1  ;;  %s2523_s10 = smov 124   ;;  %s2524_s11 = smov 88   ;;  %vm1746_vm7 = vcmask 162816   ;;  %vm1748_vm8 = vcmask 195584   ;;  %vm1750_vm9 = vcmask 228352  }
  0x5b   : > { %2094 = vmatprep.subr.mxu0 %v2518_v0  ;;  %s2525_s12 = smov 120   ;;  %s2526_s30 = smov 116  }
  0x5c   : > { %2095 = vmatpush3.msra.mxu0 %v283_v2  ;;  %s2527_s29 = smov 84   ;;  %s2528_s6 = smov 72  }
  0x5d   : > { %2096 = vmatprep.subr.mxu0 %v2518_v0  ;;  %s2529_s28 = smov 68   ;;  %s2530_s7 = smov 80  }
  0x5e   : > { %2097 = vmatpush3.msra.mxu0 %v282_v3  ;;  %s2531_s9 = smov 112   ;;  %s2532_s16 = smov 76  }
  0x5f   : > { %2098 = vmatprep.subr.mxu0 %v2518_v0  ;;  %s2533_s17 = smov 108   ;;  %p2984_p0 = scmp.ne.s32.totalorder %s2978_s23, 0 }
  0x60   : > { %2099 = vmatpush3.msra.mxu0 %v281_v4 }
  0x61   : > { %2101 = vmatmul.mubr.msk.f32.vlgmr.msra.gmra.mxu0 %vm285_vm1, %v280_v5  ;;  %2123 = vmatprep.subr.mxu0 %v2518_v0 }
  0x62   : > { %2125 = vmatprep.mubr.msk.f32.mxu0 %vm2519_vm0, %v2518_v0 }
 0x121   : > { %v355_v6 = vpop.f32.mrf.mxu0 }
 0x122   : > { %360 = vst.msk [vmem:[#allocation2] sm:$0xff] %vm359_vm2, %v355_v6 }
 0x123   : > { %v2102_v7 = vpop.f32.mrf.mxu0 }
 0x129   : > { %v2728_v8 = vld [vmem:[#allocation2] sm:$0xff] }
 0x12a   : > { %453 = vrot.lane.b32.xlu1 %v2728_v8, %s2520_s24  ;;  %363 = vrot.lane.b32.xlu0 %v2728_v8, %s2521_s26  ;;  %s2534_s24 = smov 104   ;;  %s2535_s26 = smov 100  }
 0x12e   : > { %533 = vrot.lane.b32.xlu1 %v2728_v8, %s2522_s8  ;;  %s2007_s8 = sshll.u32 %s2701_s13, 6 }
 0x132   : > { %531 = vrot.lane.b32.xlu1 %v2728_v8, %s2523_s10  ;;  %s2781_s10 = scalar_lea.vmem [#allocation11], %s2007_s8  ;;  %s2548_s8 = smov 24  }
 0x136   : > { %702 = vrot.lane.b32.xlu1 %v2728_v8, %s2524_s11  ;;  %s2536_s11 = smov 60  }
 0x13a   : > { %700 = vrot.lane.b32.xlu1 %v2728_v8, %s2525_s12  ;;  %s2537_s12 = smov 52  }
 0x13e   : > { %869 = vrot.lane.b32.xlu1 %v2728_v8, %s2526_s30  ;;  %s2538_s30 = smov 48  }
 0x19c   : > { %v454_v9 = vpop.permute.xlu1 %453  ;;  %v364_v10 = vpop.permute.xlu0 %363 }
 0x19d   : > { %2104 = vmatpush3.xpose.msk.msra.mxu1 %vm365_vm3, %v364_v10 }
 0x19e   : > { %2108 = vmatprep.subr.mxu1 %v2518_v0 }
 0x1a0   : > { %v2739_v11 = vpop.permute.xlu1 %533  ;;  %2106 = vmatmul.mubr.msk.f32.vlgmr.msra.gmra.mxu1 %vm365_vm3, %v2728_v8 }
 0x1a1   : > { %2109 = vmatpush3.msra.mxu1 %v454_v9  ;;  %2110 = vmatprep.mubr.msk.f32.mxu1 %vm2519_vm0, %v2518_v0 }
 0x1a2   : > { %2113 = vmatprep.subr.mxu1 %v2518_v0 }
 0x1a4   : > { %v2746_v12 = vpop.permute.xlu1 %531 }
 0x1a8   : > { %v703_v13 = vpop.permute.xlu1 %702 }
 0x1a9   : > { %2124 = vmatpush3.xpose.msk.msra.mxu0 %vm365_vm3, %v703_v13 }
 0x1aa   : > { %2133 = vmatprep.subr.mxu0 %v2518_v0 }
 0x1ac   : > { %v701_v14 = vpop.permute.xlu1 %700 }
 0x1ad   : > { %2126 = vmatmul.mubr.msk.f32.vlgmr.msra.gmra.mxu0 %vm365_vm3, %v701_v14 }
 0x1ae   : > { %2135 = vmatprep.mubr.msk.f32.mxu0 %vm2519_vm0, %v2518_v0 }
 0x1b0   : > { %v870_v24 = vpop.permute.xlu1 %869 }
 0x260   : > { %v436_v15 = vpop.f32.mrf.mxu1 }
 0x261   : > { %v441_v16 = vsel %vm440_vm4, %v436_v15, -inf }
 0x262   : > { %442 = vmax.xlane.f32.xlu0 %v441_v16  ;;  %v2107_v17 = vpop.f32.mrf.mxu1 }
 0x26d   : > { %v2754_v18 = vpop.f32.mrf.mxu0 }
 0x26e   : > { %v778_v27 = vsel %vm440_vm4, %v2754_v18, -inf }
 0x26f   : > { %v2127_v19 = vpop.f32.mrf.mxu0 }
 0x278   : > { %871 = vrot.lane.b32.xlu0 %v2728_v8, %s2527_s29  ;;  %s2539_s29 = smov 56  }
 0x27c   : > { %1378 = vrot.lane.b32.xlu0 %v2728_v8, %s2528_s6  ;;  %s2540_s6 = smov 40  }
 0x280   : > { %1547 = vrot.lane.b32.xlu0 %v2728_v8, %s2529_s28  ;;  %s2541_s28 = smov 44  }
 0x2eb   : > { %v443_v20 = vpop.xlane.xlu0 %442 }
 0x2ec   : > { %v444_v21 = vsub.f32 %v436_v15, %v443_v20 }
 0x2ee   : > { %v445_v22 = vmul.f32 1.442695, %v444_v21 }
 0x2ef   : > { %v872_v23 = vpop.permute.xlu0 %871 }
 0x2f0   : > { %2301 = vpow2.f32 %v445_v22  ;;  %2134 = vmatpush3.xpose.msk.msra.mxu0 %vm365_vm3, %v872_v23 }
 0x2f1   : > { %2143 = vmatprep.subr.mxu0 %v2518_v0 }
 0x2f3   : > { %2136 = vmatmul.mubr.msk.f32.vlgmr.msra.gmra.mxu0 %vm365_vm3, %v870_v24  ;;  %v1379_v33 = vpop.permute.xlu0 %1378 }
 0x2f4   : > { %2145 = vmatprep.mubr.msk.f32.mxu0 %vm2519_vm0, %v2518_v0 }
 0x2f7   : > { %v1548_v37 = vpop.permute.xlu0 %1547 }
 0x2fd   : > { %v2302_v25 = vpop.eup %2301 }
 0x2fe   : > { %v447_v26 = vsel %vm440_vm4, %v2302_v25, 0.0 }
 0x2ff   : > { %448 = vadd.xlane.f32.xlu1 %v447_v26 }
 0x310   : > { %1040 = vrot.lane.b32.xlu1 %v2728_v8, %s2530_s7  ;;  %s2542_s7 = smov 36  }
 0x314   : > { %1038 = vrot.lane.b32.xlu1 %v2728_v8, %s2531_s9  ;;  %s2543_s9 = smov 4  }
 0x318   : > { %1209 = vrot.lane.b32.xlu1 %v2728_v8, %s2532_s16  ;;  %s2544_s16 = smov 8  }
 0x31c   : > { %1207 = vrot.lane.b32.xlu1 %v2728_v8, %s2533_s17  ;;  %s2545_s17 = smov 12  }
 0x320   : > { %1376 = vrot.lane.b32.xlu1 %v2728_v8, %s2534_s24  ;;  %s2546_s24 = smov 16  }
 0x324   : > { %1545 = vrot.lane.b32.xlu1 %v2728_v8, %s2535_s26  ;;  %s2547_s26 = smov 20  }
 0x348   : > { %779 = vmax.xlane.f32.xlu1 %v778_v27 }
 0x388   : > { %v449_v28 = vpop.xlane.xlu1 %448 }
 0x389   : > { %2303 = vrcp.f32 %v449_v28 }
 0x38c   : > { %v1041_v29 = vpop.permute.xlu1 %1040 }
 0x38d   : > { %2144 = vmatpush3.xpose.msk.msra.mxu0 %vm365_vm3, %v1041_v29 }
 0x38e   : > { %2153 = vmatprep.subr.mxu0 %v2518_v0 }
 0x390   : > { %v1039_v30 = vpop.permute.xlu1 %1038 }
 0x391   : > { %2146 = vmatmul.mubr.msk.f32.vlgmr.msra.gmra.mxu0 %vm365_vm3, %v1039_v30 }
 0x392   : > { %2155 = vmatprep.mubr.msk.f32.mxu0 %vm2519_vm0, %v2518_v0 }
 0x394   : > { %v1210_v31 = vpop.permute.xlu1 %1209 }
 0x395   : > { %2154 = vmatpush3.xpose.msk.msra.mxu0 %vm365_vm3, %v1210_v31 }
 0x396   : > { %v2304_v32 = vpop.eup %2303  ;;  %2163 = vmatprep.subr.mxu0 %v2518_v0 }
 0x397   : > { %v451_v34 = vmul.f32 %v2304_v32, %v2302_v25 }
 0x398   : > { %v1208_v35 = vpop.permute.xlu1 %1207 }
 0x399   : > { %452 = vst.msk [vmem:[%s2781_s10] sm:$0xff] %vm440_vm4, %v451_v34  ;;  %2111 = vmatmul.mubr.msk.f32.vlgmr.msra.gmra.mxu1 %vm440_vm4, %v451_v34  ;;  %2156 = vmatmul.mubr.msk.f32.vlgmr.msra.gmra.mxu0 %vm365_vm3, %v1208_v35 }
 0x39a   : > { %2114 = vmatpush3.xpose.msk.msra.mxu1 %vm365_vm3, %v2739_v11  ;;  %2164 = vmatpush3.xpose.msk.msra.mxu0 %vm365_vm3, %v1379_v33 }
 0x39b   : > { %2115 = vmatprep.mubr.msk.f32.mxu1 %vm2519_vm0, %v2518_v0  ;;  %2165 = vmatprep.mubr.msk.f32.mxu0 %vm2519_vm0, %v2518_v0 }
 0x39c   : > { %v1377_v36 = vpop.permute.xlu1 %1376  ;;  %2173 = vmatprep.subr.mxu0 %v2518_v0  ;;  %2118 = vmatprep.subr.mxu1 %v2518_v0 }
 0x39d   : > { %2116 = vmatmul.mubr.msk.f32.vlgmr.msra.gmra.mxu1 %vm365_vm3, %v2746_v12  ;;  %2166 = vmatmul.mubr.msk.f32.vlgmr.msra.gmra.mxu0 %vm365_vm3, %v1377_v36 }
 0x39e   : > { %2174 = vmatpush3.xpose.msk.msra.mxu0 %vm365_vm3, %v1548_v37  ;;  %2175 = vmatprep.mubr.msk.f32.mxu0 %vm2519_vm0, %v2518_v0 }
 0x39f   : > { %2120 = vmatprep.mubr.msk.f32.mxu1 %vm2519_vm0, %v2518_v0  ;;  %2183 = vmatprep.subr.mxu0 %v2518_v0 }
 0x3a0   : > { %v1546_v38 = vpop.permute.xlu1 %1545 }
 0x3a1   : > { %2176 = vmatmul.mubr.msk.f32.vlgmr.msra.gmra.mxu0 %vm365_vm3, %v1546_v38 }
 0x3a2   : > { %2191 = vmatprep.mubr.msk.f32.mxu0 %vm2519_vm0, %v2518_v0 }
 0x3b3   : > { %v943_v39 = vpop.f32.mrf.mxu0 }
 0x3b4   : > { %v947_v57 = vsel %vm440_vm4, %v943_v39, -inf }
 0x3b5   : > { %v2137_v40 = vpop.f32.mrf.mxu0 }
 0x3d1   : > { %v780_v41 = vpop.xlane.xlu1 %779 }
 0x3d2   : > { %v781_v42 = vsub.f32 %v2754_v18, %v780_v41 }
 0x3d4   : > { %v782_v44 = vmul.f32 1.442695, %v781_v42 }
 0x3d6   : > { %2305 = vpow2.f32 %v782_v44 }
 0x3e3   : > { %v2306_v59 = vpop.eup %2305 }
 0x3e4   : > { %v784_v62 = vsel %vm440_vm4, %v2306_v59, 0.0 }
 0x451   : > { %v1112_v43 = vpop.f32.mrf.mxu0 }
 0x452   : > { %v1116_v61 = vsel %vm440_vm4, %v1112_v43, -inf }
 0x453   : > { %v2147_v45 = vpop.f32.mrf.mxu0 }
 0x459   : > { %v2809_v46 = vpop.f32.mrf.mxu1  ;;  %v1281_v47 = vpop.f32.mrf.mxu0 }
 0x45a   : > { %v1285_v48 = vsel %vm440_vm4, %v1281_v47, -inf }
 0x45b   : > { %v2112_v49 = vpop.f32.mrf.mxu1  ;;  %1286 = vmax.xlane.f32.xlu1 %v1285_v48  ;;  %v2157_v50 = vpop.f32.mrf.mxu0 }
 0x45d   : > { %v605_v51 = vpop.f32.mrf.mxu1  ;;  %v1450_v52 = vpop.f32.mrf.mxu0 }
 0x45e   : > { %v609_v53 = vsel %vm440_vm4, %v605_v51, -inf  ;;  %v1454_v63 = vsel %vm440_vm4, %v1450_v52, -inf }
 0x45f   : > { %610 = vmax.xlane.f32.xlu0 %v609_v53  ;;  %v2117_v54 = vpop.f32.mrf.mxu1  ;;  %v2167_v55 = vpop.f32.mrf.mxu0 }
 0x461   : > { %v1619_v56 = vpop.f32.mrf.mxu0 }
 0x462   : > { %v1623_v58 = vsel %vm440_vm4, %v1619_v56, -inf }
 0x463   : > { %948 = vmax.xlane.f32.xlu0 %v947_v57  ;;  %1624 = vmax.xlane.f32.xlu1 %v1623_v58  ;;  %v2177_v60 = vpop.f32.mrf.mxu0 }
 0x467   : > { %1117 = vmax.xlane.f32.xlu0 %v1116_v61  ;;  %785 = vadd.xlane.f32.xlu1 %v784_v62 }
 0x46b   : > { %1455 = vmax.xlane.f32.xlu0 %v1454_v63 }
 0x4e4   : > { %v1287_v1 = vpop.xlane.xlu1 %1286 }
 0x4e5   : > { %v1288_v3 = vsub.f32 %v1281_v47, %v1287_v1 }
 0x4e7   : > { %v1289_v7 = vmul.f32 1.442695, %v1288_v3 }
 0x4e8   : > { %v611_v2 = vpop.xlane.xlu0 %610 }
 0x4e9   : > { %v612_v14 = vsub.f32 %v605_v51, %v611_v2 }
 0x4eb   : > { %v613_v19 = vmul.f32 1.442695, %v612_v14 }
 0x4ec   : > { %v949_v4 = vpop.xlane.xlu0 %948  ;;  %v1625_v5 = vpop.xlane.xlu1 %1624 }
 0x4ed   : > { %v950_v6 = vsub.f32 %v943_v39, %v949_v4  ;;  %v1626_v10 = vsub.f32 %v1619_v56, %v1625_v5  ;;  %v1757_v4 = vld [vmem:[#allocation9 + $0x18] sm:$0xff]  ;;  %v1756_v5 = vld [vmem:[#allocation9 + $0x10] sm:$0xff] }
 0x4ee   : > { %2184 = vmatpush3.msra.mxu0 %v1757_v4 }
 0x4ef   : > { %v951_v9 = vmul.f32 1.442695, %v950_v6  ;;  %v1627_v15 = vmul.f32 1.442695, %v1626_v10  ;;  %2185 = vmatprep.subr.mxu0 %v2518_v0  ;;  %v1754_v10 = vld [vmem:[#allocation9] sm:$0xff] }
 0x4f0   : > { %v1118_v11 = vpop.xlane.xlu0 %1117  ;;  %v786_v12 = vpop.xlane.xlu1 %785  ;;  %2186 = vmatpush3.msra.mxu0 %v1756_v5 }
 0x4f1   : > { %2307 = vpow2.f32 %v951_v9  ;;  %v1119_v13 = vsub.f32 %v1112_v43, %v1118_v11  ;;  %2187 = vmatprep.subr.mxu0 %v2518_v0 }
 0x4f2   : > { %2309 = vpow2.f32 %v1289_v7  ;;  %v1755_v7 = vld [vmem:[#allocation9 + $0x8] sm:$0xff] }
 0x4f3   : > { %v1120_v16 = vmul.f32 1.442695, %v1119_v13  ;;  %2311 = vrcp.f32 %v786_v12  ;;  %2188 = vmatpush3.msra.mxu0 %v1755_v7 }
 0x4f4   : > { %v1456_v17 = vpop.xlane.xlu0 %1455  ;;  %2189 = vmatprep.subr.mxu0 %v2518_v0 }
 0x4f5   : > { %2313 = vpow2.f32 %v1120_v16  ;;  %v1457_v18 = vsub.f32 %v1450_v52, %v1456_v17  ;;  %2190 = vmatpush3.msra.mxu0 %v1754_v10 }
 0x4f6   : > { %2315 = vpow2.f32 %v1627_v15 }
 0x4f7   : > { %v1458_v20 = vmul.f32 1.442695, %v1457_v18 }
 0x4f9   : > { %2317 = vpow2.f32 %v1458_v20 }
 0x4fa   : > { %2319 = vpow2.f32 %v613_v19 }
 0x4fe   : > { %v2308_v21 = vpop.eup %2307 }
 0x4ff   : > { %v2310_v22 = vpop.eup %2309  ;;  %v953_v23 = vsel %vm440_vm4, %v2308_v21, 0.0 }
 0x500   : > { %v2312_v24 = vpop.eup %2311  ;;  %954 = vadd.xlane.f32.xlu0 %v953_v23  ;;  %v1291_v27 = vsel %vm440_vm4, %v2310_v22, 0.0 }
 0x501   : > { %v2819_v25 = vmul.f32 %v2312_v24, %v2306_v59 }
 0x502   : > { %v2314_v26 = vpop.eup %2313 }
 0x503   : > { %v1122_v28 = vsel %vm440_vm4, %v2314_v26, 0.0  ;;  %2018 = vst.msk [vmem:[%s2781_s10 + $0x10] sm:$0xff] %vm440_vm4, %v2819_v25  ;;  %v2316_v29 = vpop.eup %2315 }
 0x504   : > { %1292 = vadd.xlane.f32.xlu0 %v1291_v27  ;;  %1123 = vadd.xlane.f32.xlu1 %v1122_v28  ;;  %v1629_v32 = vsel %vm440_vm4, %v2316_v29, 0.0 }
 0x506   : > { %v2318_v30 = vpop.eup %2317 }
 0x507   : > { %v1460_v31 = vsel %vm440_vm4, %v2318_v30, 0.0  ;;  %v2320_v33 = vpop.eup %2319 }
 0x508   : > { %1461 = vadd.xlane.f32.xlu1 %v1460_v31  ;;  %1630 = vadd.xlane.f32.xlu0 %v1629_v32  ;;  %v615_v34 = vsel %vm440_vm4, %v2320_v33, 0.0 }
 0x50c   : > { %616 = vadd.xlane.f32.xlu0 %v615_v34 }
 0x519   : > { %622 = vrot.lane.b32.xlu1 %v2728_v8, %s2536_s11  ;;  %s2549_s11 = smov 28  }
 0x51d   : > { %960 = vrot.lane.b32.xlu1 %v2728_v8, %s2537_s12  ;;  %s2049_s12 = sshll.u32 %s2604_s22, 10 }
 0x521   : > { %1129 = vrot.lane.b32.xlu1 %v2728_v8, %s2538_s30  ;;  %s1871_s30 = sshll.u32 %s2781_s10, 4  ;;  %s2890_s30 = int_to_ptr.vmem [resolvable:$true] %s1871_s30 }
 0x522   : > { %791 = vrot.lane.b32.xlu0 %v2728_v8, %s2539_s29 }
 0x525   : > { %1467 = vrot.lane.b32.xlu1 %v2728_v8, %s2540_s6 }
 0x526   : > { %1298 = vrot.lane.b32.xlu0 %v2728_v8, %s2541_s28  ;;  %s2888_s28 = scalar_lea.hbm %s2968_s5, %s2049_s12 }
 0x52a   : > { %1636 = vrot.lane.b32.xlu0 %v2728_v8, %s2542_s7  ;;  %s1845_s7 = scalar_lea.sflag [#allocation12], %s2701_s13 }
 0x589   : > { %v955_v35 = vpop.xlane.xlu0 %954 }
 0x58a   : > { %2321 = vrcp.f32 %v955_v35 }
 0x58d   : > { %v1293_v36 = vpop.xlane.xlu0 %1292  ;;  %v1124_v37 = vpop.xlane.xlu1 %1123 }
 0x58e   : > { %2323 = vrcp.f32 %v1293_v36 }
 0x58f   : > { %2325 = vrcp.f32 %v1124_v37 }
 0x591   : > { %v1631_v38 = vpop.xlane.xlu0 %1630  ;;  %v1462_v39 = vpop.xlane.xlu1 %1461 }
 0x592   : > { %2327 = vrcp.f32 %v1631_v38 }
 0x593   : > { %2329 = vrcp.f32 %v1462_v39 }
 0x595   : > { %v617_v40 = vpop.xlane.xlu0 %616  ;;  %v623_v41 = vpop.permute.xlu1 %622 }
 0x596   : > { %2331 = vrcp.f32 %v617_v40  ;;  %2119 = vmatpush3.msra.mxu1 %v623_v41 }
 0x597   : > { %v2322_v42 = vpop.eup %2321  ;;  %2128 = vmatprep.subr.mxu1 %v2518_v0 }
 0x598   : > { %v957_v8 = vmul.f32 %v2322_v42, %v2308_v21 }
 0x599   : > { %v792_v54 = vpop.permute.xlu0 %791  ;;  %v961_v55 = vpop.permute.xlu1 %960 }
 0x59a   : > { %2022 = vst.msk [vmem:[%s2781_s10 + $0x18] sm:$0xff] %vm440_vm4, %v957_v8 }
 0x59b   : > { %v2324_v43 = vpop.eup %2323 }
 0x59c   : > { %v2326_v44 = vpop.eup %2325  ;;  %v1295_v45 = vmul.f32 %v2324_v43, %v2310_v22 }
 0x59d   : > { %v1126_v47 = vmul.f32 %v2326_v44, %v2314_v26  ;;  %v1130_v56 = vpop.permute.xlu1 %1129  ;;  %v1299_v57 = vpop.permute.xlu0 %1298 }
 0x59e   : > { %2030 = vst.msk [vmem:[%s2781_s10 + $0x28] sm:$0xff] %vm440_vm4, %v1295_v45 }
 0x59f   : > { %v2328_v48 = vpop.eup %2327  ;;  %2026 = vst.msk [vmem:[%s2781_s10 + $0x20] sm:$0xff] %vm440_vm4, %v1126_v47 }
 0x5a0   : > { %v2330_v49 = vpop.eup %2329  ;;  %v1633_v50 = vmul.f32 %v2328_v48, %v2316_v29 }
 0x5a1   : > { %v1464_v51 = vmul.f32 %v2330_v49, %v2318_v30  ;;  %v1468_v58 = vpop.permute.xlu1 %1467  ;;  %v1637_v59 = vpop.permute.xlu0 %1636 }
 0x5a2   : > { %2038 = vst.msk [vmem:[%s2781_s10 + $0x38] sm:$0xff] %vm440_vm4, %v1633_v50 }
 0x5a3   : > { %v2332_v52 = vpop.eup %2331  ;;  %2034 = vst.msk [vmem:[%s2781_s10 + $0x30] sm:$0xff] %vm440_vm4, %v1464_v51 }
 0x5a4   : > { %v619_v53 = vmul.f32 %v2332_v52, %v2320_v33 }
 0x5a6   : > { %2014 = vst.msk [vmem:[%s2781_s10 + $0x8] sm:$0xff] %vm440_vm4, %v619_v53  ;;  %2121 = vmatmul.mubr.msk.f32.vlgmr.msra.gmra.mxu1 %vm440_vm4, %v619_v53 }
 0x5a7   : > { %2129 = vmatpush3.msra.mxu1 %v792_v54  ;;  %2130 = vmatprep.mubr.msk.f32.mxu1 %vm2519_vm0, %v2518_v0 }
 0x5a8   : > { %2138 = vmatprep.subr.mxu1 %v2518_v0 }
 0x5aa   : > { %2131 = vmatmul.mubr.msk.f32.vlgmr.msra.gmra.mxu1 %vm440_vm4, %v2819_v25 }
 0x5ab   : > { %2139 = vmatpush3.msra.mxu1 %v961_v55  ;;  %2140 = vmatprep.mubr.msk.f32.mxu1 %vm2519_vm0, %v2518_v0 }
 0x5ac   : > { %2148 = vmatprep.subr.mxu1 %v2518_v0 }
 0x5ae   : > { %2141 = vmatmul.mubr.msk.f32.vlgmr.msra.gmra.mxu1 %vm440_vm4, %v957_v8 }
 0x5af   : > { %2149 = vmatpush3.msra.mxu1 %v1130_v56  ;;  %2150 = vmatprep.mubr.msk.f32.mxu1 %vm2519_vm0, %v2518_v0 }
 0x5b0   : > { %2158 = vmatprep.subr.mxu1 %v2518_v0 }
 0x5b2   : > { %2151 = vmatmul.mubr.msk.f32.vlgmr.msra.gmra.mxu1 %vm440_vm4, %v1126_v47 }
 0x5b3   : > { %2159 = vmatpush3.msra.mxu1 %v1299_v57  ;;  %2160 = vmatprep.mubr.msk.f32.mxu1 %vm2519_vm0, %v2518_v0 }
 0x5b4   : > { %2168 = vmatprep.subr.mxu1 %v2518_v0 }
 0x5b6   : > { %2161 = vmatmul.mubr.msk.f32.vlgmr.msra.gmra.mxu1 %vm440_vm4, %v1295_v45 }
 0x5b7   : > { %2169 = vmatpush3.msra.mxu1 %v1468_v58  ;;  %2170 = vmatprep.mubr.msk.f32.mxu1 %vm2519_vm0, %v2518_v0 }
 0x5b8   : > { %2178 = vmatprep.subr.mxu1 %v2518_v0 }
 0x5ba   : > { %2171 = vmatmul.mubr.msk.f32.vlgmr.msra.gmra.mxu1 %vm440_vm4, %v1464_v51 }
 0x5bb   : > { %2179 = vmatpush3.msra.mxu1 %v1637_v59  ;;  %2180 = vmatprep.mubr.msk.f32.mxu1 %vm2519_vm0, %v2518_v0 }
 0x5be   : > { %2181 = vmatmul.mubr.msk.f32.vlgmr.msra.gmra.mxu1 %vm440_vm4, %v1633_v50 }
 0x666   : > { %v694_v60 = vpop.f32.mrf.mxu1 }
 0x667   : > { %1713 = vrot.lane.b32.xlu1 %v694_v60, %s2543_s9  ;;  %s2413_s9 = scalar_lea.vmem %s2890_s30, 1024 }
 0x668   : > { %v2122_v61 = vpop.f32.mrf.mxu1  ;;  %p2414_p11 = scmp.ne.s32.totalorder %s2890_s30, %s2413_s9 }
 0x66a   : > { %v863_v62 = vpop.f32.mrf.mxu1  ;;  %p2415_p1 = pnand %p2414_p11, %p2984_p0 }
 0x66b   : > { %1717 = vrot.lane.b32.xlu0 %v863_v62, %s2544_s16 }
 0x66c   : > { %v2132_v63 = vpop.f32.mrf.mxu1  ;;  %p2416_p2 = pneg %p2415_p1 }
 0x66e   : > { %v1032_v1 = vpop.f32.mrf.mxu1 }
 0x66f   : > { %1721 = vrot.lane.b32.xlu1 %v1032_v1, %s2545_s17  ;;  %s2550_s17 = smov [#allocation11]  }
 0x670   : > { %v2142_v2 = vpop.f32.mrf.mxu1 }
 0x672   : > { %v1201_v3 = vpop.f32.mrf.mxu1 }
 0x673   : > { %1725 = vrot.lane.b32.xlu0 %v1201_v3, %s2546_s24  ;;  %s2417_s24 = sshll.u32 %s2550_s17, 4  ;;  %s2418_s24 = int_to_ptr.vmem [resolvable:$false] %s2417_s24 }
 0x674   : > { %v2152_v6 = vpop.f32.mrf.mxu1  ;;  %s2419_s10 = scalar_lea.vmem %s2418_s24, 2048  ;;  %p2420_p6 = scmp.lt.s32.totalorder %s2890_s30, %s2418_s24 }
 0x675   : > { %p2421_p12 = scmp.lt.s32.totalorder %s2419_s10, %s2413_s9 }
 0x676   : > { %v1370_v9 = vpop.f32.mrf.mxu1 }
 0x677   : > { %1729 = vrot.lane.b32.xlu1 %v1370_v9, %s2547_s26  ;;  %p2422_p7 = por %p2421_p12, %p2420_p6 }
 0x678   : > { %v2162_v11 = vpop.f32.mrf.mxu1 }
 0x679   : > { %p2423_p9 = pnand %p2422_p7, %p2416_p2 }
 0x67a   : > { %v1539_v12 = vpop.f32.mrf.mxu1 }
 0x67b   : > { %1733 = vrot.lane.b32.xlu0 %v1539_v12, %s2548_s8 }
 0x67c   : > { %v2172_v13 = vpop.f32.mrf.mxu1 }
 0x67e   : > { %v1708_v14 = vpop.f32.mrf.mxu1 }
 0x67f   : > { %1737 = vrot.lane.b32.xlu1 %v1708_v14, %s2549_s11 }
 0x680   : > { %v2182_v15 = vpop.f32.mrf.mxu1 }
 0x6d9   : > { %v1714_v16 = vpop.permute.xlu1 %1713 }
 0x6da   : > { %v1740_v20 = vsel %vm365_vm3, %v2809_v46, %v1714_v16 }
 0x6dd   : > { %v1718_v17 = vpop.permute.xlu0 %1717 }
 0x6de   : > { %v1741_v0 = vsel %vm440_vm4, %v1740_v20, %v1718_v17 }
 0x6e1   : > { %v1722_v18 = vpop.permute.xlu1 %1721 }
 0x6e2   : > { %v1743_v22 = vsel %vm1742_vm5, %v1741_v0, %v1722_v18 }
 0x6e5   : > { %v1726_v19 = vpop.permute.xlu0 %1725 }
 0x6e6   : > { %v1745_v24 = vsel %vm1744_vm6, %v1743_v22, %v1726_v19 }
 0x6e9   : > { %v1730_v21 = vpop.permute.xlu1 %1729 }
 0x6ea   : > { %v1747_v25 = vsel %vm1746_vm7, %v1745_v24, %v1730_v21 }
 0x6ed   : > { %v1734_v23 = vpop.permute.xlu0 %1733 }
 0x6ee   : > { %v1749_v26 = vsel %vm1748_vm8, %v1747_v25, %v1734_v23 }
 0x6f1   : > { %v1738_v27 = vpop.permute.xlu1 %1737 }
 0x6f2   : > { %v1751_v28 = vsel %vm1750_vm9, %v1749_v26, %v1738_v27 }
 0x6f3   : > { %1752 = vst.msk [vmem:[#allocation3] sm:$0xff] %vm285_vm1, %v1751_v28 }
 0x6fa   : > { %v1753_v46 = vld [vmem:[#allocation3] sm:$0xff] }
 0x6fb   : > { %2192 = vmatmul.mubr.msk.f32.vlgmr.msra.gmra.mxu0 %vm285_vm1, %v1753_v46 }
 0x6fc   : > { %2426 = shalt.err (!%p2423_p9)
}
 0x6fd   : > { %s2427_s26 = scalar_lea.hbm %s2888_s28, 1024  ;;  %s2431_s12 = scalar_lea.hbm %s2968_s5, 2048 }
 0x6fe   : > { %p2428_p13 = scmp.ne.s32.totalorder %s2888_s28, %s2427_s26  ;;  %p2432_p4 = scmp.lt.s32.totalorder %s2888_s28, %s2968_s5 }
 0x6ff   : > { %p2433_p8 = scmp.lt.s32.totalorder %s2431_s12, %s2427_s26 }
 0x700   : > { %p2429_p5 = pnand %p2428_p13, %p2984_p0 }
 0x701   : > { %p2434_p3 = por %p2433_p8, %p2432_p4 }
 0x702   : > { %p2430_p10 = pneg %p2429_p5 }
 0x704   : > { %p2435_p11 = pnand %p2434_p3, %p2430_p10 }
 0x706   : > { %2438 = shalt.err (!%p2435_p11)
}
 0x707   : > { %s2551_s9 = smov 128   ;;  %v2040_v29 = vld [vmem:[%s2966_s3] ss:$0 sm:$0xff]  ;;  %s2044_s10 = sshll.u32 %s2604_s22, 7 }
 0x708   : > { %2205 = dma.vmem_to_hbm [thread:$0]  (%p2984_p0), %s2890_s30, 1024, %s2888_s28, %s1845_s7, %s2551_s9, %s2551_s9, %s2544_s16  }
 0x709   : > { %s272_s26 = scalar_lea.vmem [#allocation10], %s2003_s14  ;;  %s2925_s29 = scalar_lea.hbm %s2967_s4, %s2044_s10 }
 0x70a   : > { %s1858_s8 = sshll.u32 %s272_s26, 4  ;;  %s1840_s16 = scalar_lea.sflag [#allocation6], %s2701_s13  ;;  %s1859_s8 = int_to_ptr.vmem [resolvable:$true] %s1858_s8 }
 0x70b   : > { %s2439_s30 = scalar_lea.vmem %s1859_s8, 128  ;;  %s2552_s22 = smov [#allocation10]  }
 0x70c   : > { %p2440_p1 = scmp.ne.s32.totalorder %s1859_s8, %s2439_s30  ;;  %s2443_s14 = sshll.u32 %s2552_s22, 4  ;;  %s2444_s14 = int_to_ptr.vmem [resolvable:$false] %s2443_s14 }
 0x70d   : > { %s2445_s28 = scalar_lea.vmem %s2444_s14, 256  ;;  %p2446_p12 = scmp.lt.s32.totalorder %s1859_s8, %s2444_s14 }
 0x70e   : > { %p2441_p2 = pnand %p2440_p1, %p2984_p0  ;;  %p2447_p7 = scmp.lt.s32.totalorder %s2445_s28, %s2439_s30 }
 0x710   : > { %p2442_p6 = pneg %p2441_p2  ;;  %p2448_p9 = por %p2447_p7, %p2446_p12 }
 0x712   : > { %p2449_p13 = pnand %p2448_p9, %p2442_p6 }
 0x7bb   : > { %v1834_v30 = vpop.f32.mrf.mxu0 }
 0x7bc   : > { %v1835_v31 = vadd.f32 %v2040_v29, %v1834_v30 }
 0x7bd   : > { %v2193_v32 = vpop.f32.mrf.mxu0 }
 0x7be   : > { %1838 = vst.msk [vmem:[%s272_s26] sm:$0xff] %vm285_vm1, %v1835_v31 }
 0x7bf   : > { %2452 = shalt.err (!%p2449_p13)
}
 0x7c0   : > { %s2453_s7 = scalar_lea.hbm %s2925_s29, 128  ;;  %s2457_s9 = scalar_lea.hbm %s2967_s4, 256 }
 0x7c1   : > { %p2454_p5 = scmp.ne.s32.totalorder %s2925_s29, %s2453_s7  ;;  %p2458_p8 = scmp.lt.s32.totalorder %s2925_s29, %s2967_s4 }
 0x7c2   : > { %p2459_p3 = scmp.lt.s32.totalorder %s2457_s9, %s2453_s7 }
 0x7c3   : > { %p2455_p10 = pnand %p2454_p5, %p2984_p0 }
 0x7c4   : > { %p2460_p11 = por %p2459_p3, %p2458_p8 }
 0x7c5   : > { %p2456_p4 = pneg %p2455_p10 }
 0x7c7   : > { %p2461_p1 = pnand %p2460_p11, %p2456_p4 }
 0x7c9   : > { %2464 = shalt.err (!%p2461_p1)
}
 0x7ca   : > { %2204 = dma.vmem_to_hbm [thread:$0]  (%p2984_p0), %s1859_s8, 128, %s2925_s29, %s1840_s16  }
 0x7cb PF: > { %s1886_s10 = sand.u32 1, %s2499_s18   ;;  %p2985_p2 = scmp.ne.s32.totalorder %s2974_s25, 0 }
 0x7cc   : > { %p2986_p6 = scmp.ge.s32.totalorder %s2511_s21, 2  ;;  %s1887_s26 = scalar_lea.sflag [#allocation6], %s1886_s10 }
 0x7ce   : > { %p2220_p12 = pnand %p2986_p6, %p2985_p2 }
 0x7d0   : > { %p2221_p7 = pneg %p2220_p12 }
 0x7d2   : > { %2490 = dma.done.wait (%p2221_p7), %s1887_s26, 128  }
 0x7d3   : > { %2492 = vsyncadd (%p2221_p7), %s1887_s26, 4294967168  ;;  %s1896_s11 = scalar_lea.sflag [#allocation12], %s1886_s10 }
 0x7d4   : > { %2494 = dma.done.wait (%p2221_p7), %s1896_s11, 1024  }
 0x7d5   : > { %2496 = vsyncadd (%p2221_p7), %s1896_s11, 4294966272  ;;  %p23_p0 = scmp.ge.s32.totalorder %s2655_s15, 4   ;;  %s2987_s18 = smov %s2503_s19 }
 0x7d6   : > { %s2988_s19 = smov %s2507_s20  ;;  %s2989_s20 = smov %s2671_s27 }
 0x7d7   : > { %s2990_s21 = smov %s2655_s15  ;;  %25 = sbr.rel (!%p23_p0) target bundleno = 8 (0x8), region = 113 }
 0x7dc   :  { %1901 = vsyncpa [#allocation5], 1 }
 0x7dd   :  { %1903 = vsyncpa [#allocation5 + $0x1], 1 }
 0x7de   :  { %1904 = vsyncpa [#allocation8], 1 }
 0x7df   :  { %1905 = vsyncpa [#allocation6], 1 }
 0x7e0   :  { %1907 = vsyncpa [#allocation6 + $0x1], 1 }
 0x7e1   :  { %1908 = vsyncpa [#allocation12], 1 }
 0x7e2   :  { %1910 = vsyncpa [#allocation12 + $0x1], 1 }

</bundles_post_ra>
